<compile_context>
chip_gen: v7x
topology: tpu7x:2x2x1
jax: 0.10.0
libtpu: 0.0.40
codegen_flags: <defaults>
</compile_context>

<pallas_src>
import numpy as np

import jax
import jax.numpy as jnp
from jax.experimental import pallas as pl
from jax.experimental.pallas import tpu as pltpu


# --------------------------------------------------------------------------------------
# Fused kernel (one grid step == one sample)
# --------------------------------------------------------------------------------------
def _lenet_fused_kernel(xs_ref, w1_ref, b1_ref, w2_ref, b2_ref,
                        wf1_ref, bf1_ref, wf2_ref, bf2_ref, wf3_ref, bf3_ref,
                        o_ref):
    # ---- stage 1: conv1(k=3) + bias + ReLU + maxpool(2,2), parity-fused ------------------
    # xs_ref block (1, 36, 36): row = input offset oh*6+ow, col = coarse position m*6+n,
    #   xs[oh*6+ow, m*6+n] = x[4m+oh, 4n+ow].
    # w1_ref (128, 36): packed conv1 weights, row = (p*2+q)*32 + (ah*2+aw)*8 + c
    #   (p,q = pool parity, ah,aw = output parity, c = out channel, c=6,7 are zero padding).
    xs = xs_ref[0].astype(jnp.bfloat16)                                    # (36, 36)
    z = jnp.dot(w1_ref[...], xs, preferred_element_type=jnp.float32)       # (128, 36)
    # max over the 4 pool parities (p,q) == max over 4 aligned 32-row blocks
    zp = jnp.maximum(jnp.maximum(z[0:32, :], z[32:64, :]),
                     jnp.maximum(z[64:96, :], z[96:128, :]))                # (32, 36)
    a1 = jnp.maximum(zp + b1_ref[...], 0.0)                                 # (32, 36)
    # a1[(ah*2+aw)*8 + c, m*6+n] == pool1[2m+ah, 2n+aw, c]  (rows c=6,7 of each block are 0)

    # ---- stage 2: conv2(k=3) + bias + ReLU + maxpool(2,2), parity-fused ------------------
    # For pooled output (u,v) and pool parity (r,s):
    #   conv2pre[2u+r, 2v+s, d] = sum_{kh,kw,c} W2[d,c,kh,kw] * pool1[2u+r+kh, 2v+s+kw, c]
    # pool1[2u+t, 2v+w, c]  (t=r+kh, w=s+kw) lives in a1 row-block (t%2)*2+(w%2) at lane
    #   (u + t//2)*6 + (v + w//2)  ==  (u*6+v) + (t//2)*6 + (w//2)   -> a static lane shift.
    shifted = {}

    def shifted_block(ta, wa, th, wh):
        key = (ta, wa, th, wh)
        if key not in shifted:
            blk = a1[(ta * 2 + wa) * 8:(ta * 2 + wa) * 8 + 8, :]            # (8, 36)
            k = th * 6 + wh
            shifted[key] = blk[:, k:k + 29].astype(jnp.bfloat16)            # (8, 29)
        return shifted[key]

    w2kk = [w2_ref[i] for i in range(9)]                                    # 9 x (16, 8) bf16
    pre = None
    for r in range(2):
        for s in range(2):
            acc = None
            for kh in range(3):
                tt = r + kh
                for kw in range(3):
                    ww = s + kw
                    term = jnp.dot(w2kk[kh * 3 + kw],
                                   shifted_block(tt % 2, ww % 2, tt // 2, ww // 2),
                                   preferred_element_type=jnp.float32)      # (16, 29)
                    acc = term if acc is None else acc + term
            pre = acc if pre is None else jnp.maximum(pre, acc)
    p2 = jnp.maximum(pre + b2_ref[...], 0.0)                                # (16, 29)
    # p2[d, u*6+v] == pool2[u, v, d] for u,v < 5.  Lanes {5,11,17,23} are junk and are
    # matched by all-zero rows in the packed fc1 weight.

    # ---- classifier: fc1 -> ReLU -> fc2 -> ReLU -> fc3 -----------------------------------
    # torch.flatten(x, 1) order (d*25 + u*5 + v) is folded into the packed fc1 weight, so
    # the flatten is just an accumulation over the 16 conv2 output channels.
    h = bf1_ref[...]                                                        # (1, 120) f32
    for d in range(16):
        h = h + jnp.dot(p2[d:d + 1, :].astype(jnp.bfloat16), wf1_ref[d],
                        preferred_element_type=jnp.float32)                 # (1, 120)
    h = jnp.maximum(h, 0.0).astype(jnp.bfloat16)
    h = jnp.maximum(jnp.dot(h, wf2_ref[...], preferred_element_type=jnp.float32)
                    + bf2_ref[...], 0.0).astype(jnp.bfloat16)               # (1, 84)
    out = jnp.dot(h, wf3_ref[...], preferred_element_type=jnp.float32) + bf3_ref[...]
    o_ref[0] = out                                                          # (1, 10)


# --------------------------------------------------------------------------------------
# Weight packing (torch layouts -> kernel layouts).  Done once, outside jit.
# --------------------------------------------------------------------------------------
def pack_params(p):
    w1 = np.asarray(p["conv1_w"], np.float32)        # (6, 1, 3, 3)   torch OIHW
    b1 = np.asarray(p["conv1_b"], np.float32)        # (6,)
    w1big = np.zeros((128, 36), np.float32)
    b1big = np.zeros((32, 1), np.float32)
    for ah in range(2):
        for aw in range(2):
            blk = (ah * 2 + aw) * 8
            b1big[blk:blk + 6, 0] = b1
            for pp in range(2):
                for qq in range(2):
                    base = (pp * 2 + qq) * 32 + blk
                    for c in range(6):
                        for kh in range(3):
                            for kw in range(3):
                                oh = 2 * ah + pp + kh
                                ow = 2 * aw + qq + kw
                                w1big[base + c, oh * 6 + ow] = w1[c, 0, kh, kw]

    w2 = np.asarray(p["conv2_w"], np.float32)         # (16, 6, 3, 3)
    w2p = np.zeros((9, 16, 8), np.float32)
    for kh in range(3):
        for kw in range(3):
            w2p[kh * 3 + kw, :, 0:6] = w2[:, :, kh, kw]
    b2 = np.asarray(p["conv2_b"], np.float32).reshape(16, 1)

    fc1_w = np.asarray(p["fc1_w"], np.float32)        # (120, 400)
    wf1 = np.zeros((16, 29, 120), np.float32)
    for d in range(16):
        for u in range(5):
            for v in range(5):
                wf1[d, u * 6 + v, :] = fc1_w[:, d * 25 + u * 5 + v]

    return {
        "w1": jnp.asarray(w1big, jnp.bfloat16),
        "b1": jnp.asarray(b1big, jnp.float32),
        "w2": jnp.asarray(w2p, jnp.bfloat16),
        "b2": jnp.asarray(b2, jnp.float32),
        "wf1": jnp.asarray(wf1, jnp.bfloat16),
        "bf1": jnp.asarray(np.asarray(p["fc1_b"], np.float32).reshape(1, 120)),
        "wf2": jnp.asarray(np.asarray(p["fc2_w"], np.float32).T, jnp.bfloat16),
        "bf2": jnp.asarray(np.asarray(p["fc2_b"], np.float32).reshape(1, 84)),
        "wf3": jnp.asarray(np.asarray(p["fc3_w"], np.float32).T, jnp.bfloat16),
        "bf3": jnp.asarray(np.asarray(p["fc3_b"], np.float32).reshape(1, 10)),
    }


# --------------------------------------------------------------------------------------
# Forward wrapper (jittable)
# --------------------------------------------------------------------------------------
def bnn_forward(kp, x, mask=None):
    """Forward of BayesianNeuralNetwork('decoy_mnist', rho) with sample=False, mask=None."""
    # TODO(synk): the sample=True reparameterization path (mu + softplus(rho) * eps) and the
    # target-layer masking (x[mask == 1.0] = 0 after features[3]) are not implemented; only
    # the deterministic mean-weight forward is reproduced.
    assert mask is None
    B = x.shape[0]
    xi = x[:, 0, :, :]                                     # (B, 28, 28), Cin == 1
    # Space-to-depth (stride-4) packing of the raw input only:
    #   xs[b, oh*6+ow, m*6+n] = x[b, 4m+oh, 4n+ow]
    # (1.65x the input bytes; replaces the old 9x im2col duplication in HBM).
    slabs = []
    for oh in range(6):
        for ow in range(6):
            slabs.append(xi[:, oh:oh + 21:4, ow:ow + 21:4].reshape(B, 36))
    xs = jnp.stack(slabs, axis=1)                          # (B, 36, 36)

    flops = 2 * B * (128 * 36 * 36 + 36 * 16 * 8 * 29 + 16 * 29 * 120 + 120 * 84 + 84 * 10)
    bytes_accessed = (B * 36 * 36 * 4 + B * 10 * 4
                      + 128 * 36 * 2 + 9 * 16 * 8 * 2 + 16 * 29 * 120 * 2
                      + 120 * 84 * 2 + 84 * 10 * 2 + (32 + 16 + 120 + 84 + 10) * 4)

    out = pl.pallas_call(
        _lenet_fused_kernel,
        out_shape=jax.ShapeDtypeStruct((B, 1, 10), jnp.float32),
        grid=(B,),
        in_specs=[
            pl.BlockSpec((1, 36, 36), lambda b: (b, 0, 0)),     # packed input (per sample)
            pl.BlockSpec((128, 36), lambda b: (0, 0)),          # conv1 packed weights
            pl.BlockSpec((32, 1), lambda b: (0, 0)),            # conv1 bias (parity tiled)
            pl.BlockSpec((9, 16, 8), lambda b: (0, 0, 0)),      # conv2 weights per (kh,kw)
            pl.BlockSpec((16, 1), lambda b: (0, 0)),            # conv2 bias
            pl.BlockSpec((16, 29, 120), lambda b: (0, 0, 0)),   # fc1 weights (flatten folded)
            pl.BlockSpec((1, 120), lambda b: (0, 0)),           # fc1 bias
            pl.BlockSpec((120, 84), lambda b: (0, 0)),          # fc2 weights
            pl.BlockSpec((1, 84), lambda b: (0, 0)),            # fc2 bias
            pl.BlockSpec((84, 10), lambda b: (0, 0)),           # fc3 weights
            pl.BlockSpec((1, 10), lambda b: (0, 0)),            # fc3 bias
        ],
        out_specs=pl.BlockSpec((1, 1, 10), lambda b: (b, 0, 0)),
        compiler_params=pltpu.CompilerParams(dimension_semantics=("parallel",)),
        cost_estimate=pl.CostEstimate(flops=flops, transcendentals=0,
                                      bytes_accessed=bytes_accessed),
    )(xs, kp["w1"], kp["b1"], kp["w2"], kp["b2"], kp["wf1"], kp["bf1"],
      kp["wf2"], kp["bf2"], kp["wf3"], kp["bf3"])
    return out[:, 0, :]


# --------------------------------------------------------------------------------------
# Pure-JAX reference (f32, HIGHEST precision) for a numerical self-check
# --------------------------------------------------------------------------------------
def reference_forward(p, x):
    dn = ("NCHW", "OIHW", "NCHW")
    hi = jax.lax.Precision.HIGHEST
    y = jax.lax.conv_general_dilated(x, p["conv1_w"], (1, 1), "VALID",
                                     dimension_numbers=dn, precision=hi)
    y = jnp.maximum(y + p["conv1_b"][None, :, None, None], 0.0)
    y = jax.lax.reduce_window(y, -jnp.inf, jax.lax.max, (1, 1, 2, 2), (1, 1, 2, 2), "VALID")
    y = jax.lax.conv_general_dilated(y, p["conv2_w"], (1, 1), "VALID",
                                     dimension_numbers=dn, precision=hi)
    y = jnp.maximum(y + p["conv2_b"][None, :, None, None], 0.0)
    y = jax.lax.reduce_window(y, -jnp.inf, jax.lax.max, (1, 1, 2, 2), (1, 1, 2, 2), "VALID")
    f = y.reshape(y.shape[0], -1)                        # torch.flatten(x, 1) on NCHW
    h = jnp.maximum(jnp.dot(f, p["fc1_w"].T, precision=hi) + p["fc1_b"], 0.0)
    h = jnp.maximum(jnp.dot(h, p["fc2_w"].T, precision=hi) + p["fc2_b"], 0.0)
    return jnp.dot(h, p["fc3_w"].T, precision=hi) + p["fc3_b"]


# --------------------------------------------------------------------------------------
# Driver
# --------------------------------------------------------------------------------------
if __name__ == "__main__":
    key = jax.random.PRNGKey(0)
    ks = jax.random.split(key, 11)

    # Deterministic synthetic parameters (the "mu" parameters of the Bayesian layers),
    # generated in torch layouts: conv OIHW, linear (out_features, in_features).
    params = {
        "conv1_w": 0.30 * jax.random.normal(ks[0], (6, 1, 3, 3), jnp.float32),
        "conv1_b": 0.10 * jax.random.normal(ks[1], (6,), jnp.float32),
        "conv2_w": 0.15 * jax.random.normal(ks[2], (16, 6, 3, 3), jnp.float32),
        "conv2_b": 0.10 * jax.random.normal(ks[3], (16,), jnp.float32),
        "fc1_w":   0.10 * jax.random.normal(ks[4], (120, 16 * 5 * 5), jnp.float32),
        "fc1_b":   0.10 * jax.random.normal(ks[5], (120,), jnp.float32),
        "fc2_w":   0.10 * jax.random.normal(ks[6], (84, 120), jnp.float32),
        "fc2_b":   0.10 * jax.random.normal(ks[7], (84,), jnp.float32),
        "fc3_w":   0.10 * jax.random.normal(ks[8], (10, 84), jnp.float32),
        "fc3_b":   0.10 * jax.random.normal(ks[9], (10,), jnp.float32),
    }
    # decoy_mnist-style input: NCHW, 1 channel, 28x28 (required for the 16*5*5 flatten).
    x = jax.random.normal(ks[10], (2, 1, 28, 28), jnp.float32)

    kp = pack_params(params)
    out = jax.block_until_ready(jax.jit(bnn_forward)(kp, x))
    assert out.shape == (2, 10)
    assert bool(jnp.all(jnp.isfinite(out)))

    # Numerical self-check vs. an f32 XLA reference (kernel uses bf16 MXU operands).
    ref = jax.block_until_ready(jax.jit(reference_forward)(params, x))
    err = float(jnp.max(jnp.abs(out - ref)))
    scale = float(jnp.max(jnp.abs(ref))) + 1e-6
    assert err <= 3e-2 * scale + 3e-3, (err, scale)

    print("KERNEL_OK")
</pallas_src>

<mosaic_0001>
module attributes {stable_mosaic.version = 11 : i64} {
  func.func @_lenet_fused_kernel(%arg0: i32, %arg1: memref<1x36x36xf32, #tpu.memory_space<vmem>>, %arg2: memref<128x36xbf16, #tpu.memory_space<vmem>>, %arg3: memref<32x1xf32, #tpu.memory_space<vmem>>, %arg4: memref<9x16x8xbf16, #tpu.memory_space<vmem>>, %arg5: memref<16x1xf32, #tpu.memory_space<vmem>>, %arg6: memref<16x29x120xbf16, #tpu.memory_space<vmem>>, %arg7: memref<1x120xf32, #tpu.memory_space<vmem>>, %arg8: memref<120x84xbf16, #tpu.memory_space<vmem>>, %arg9: memref<1x84xf32, #tpu.memory_space<vmem>>, %arg10: memref<84x10xbf16, #tpu.memory_space<vmem>>, %arg11: memref<1x10xf32, #tpu.memory_space<vmem>>, %arg12: memref<1x1x10xf32, #tpu.memory_space<vmem>>) attributes {dimension_semantics = [#tpu.dimension_semantics<parallel>], iteration_bounds = array<i64: 2>, scalar_prefetch = 0 : i64, scratch_operands = 0 : i64, tpu.core_type = #tpu.core_type<tc>, window_params = [{transform_indices = @transform_0, window_bounds = array<i64: 1, 36, 36>}, {pipeline_mode = #tpu.pipeline_mode<synchronous>, transform_indices = @transform_1, window_bounds = array<i64: 128, 36>}, {pipeline_mode = #tpu.pipeline_mode<synchronous>, transform_indices = @transform_2, window_bounds = array<i64: 32, 1>}, {pipeline_mode = #tpu.pipeline_mode<synchronous>, transform_indices = @transform_3, window_bounds = array<i64: 9, 16, 8>}, {pipeline_mode = #tpu.pipeline_mode<synchronous>, transform_indices = @transform_4, window_bounds = array<i64: 16, 1>}, {pipeline_mode = #tpu.pipeline_mode<synchronous>, transform_indices = @transform_5, window_bounds = array<i64: 16, 29, 120>}, {pipeline_mode = #tpu.pipeline_mode<synchronous>, transform_indices = @transform_6, window_bounds = array<i64: 1, 120>}, {pipeline_mode = #tpu.pipeline_mode<synchronous>, transform_indices = @transform_7, window_bounds = array<i64: 120, 84>}, {pipeline_mode = #tpu.pipeline_mode<synchronous>, transform_indices = @transform_8, window_bounds = array<i64: 1, 84>}, {pipeline_mode = #tpu.pipeline_mode<synchronous>, transform_indices = @transform_9, window_bounds = array<i64: 84, 10>}, {pipeline_mode = #tpu.pipeline_mode<synchronous>, transform_indices = @transform_10, window_bounds = array<i64: 1, 10>}, {transform_indices = @transform_11, window_bounds = array<i64: 1, 1, 10>}]} {
    %c0 = arith.constant 0 : index
    %c0_0 = arith.constant 0 : index
    %c0_1 = arith.constant 0 : index
    %0 = vector.load %arg1[%c0, %c0_0, %c0_1] : memref<1x36x36xf32, #tpu.memory_space<vmem>>, vector<1x36x36xf32>
    %1 = vector.shape_cast %0 : vector<1x36x36xf32> to vector<36x36xf32>
    %2 = arith.truncf %1 : vector<36x36xf32> to vector<36x36xbf16>
    %c0_2 = arith.constant 0 : index
    %c0_3 = arith.constant 0 : index
    %3 = vector.load %arg2[%c0_2, %c0_3] : memref<128x36xbf16, #tpu.memory_space<vmem>>, vector<128x36xbf16>
    %cst = arith.constant dense<0.000000e+00> : vector<128x36xf32>
    %4 = tpu.matmul %3, %2, %cst {dimension_numbers = #tpu.dot_dimension_numbers<[1], [0], [0], [1], [0, 0, 1, 1], [], []>} : vector<128x36xbf16>, vector<36x36xbf16>, vector<128x36xf32> -> vector<128x36xf32>
    %5 = vector.extract_strided_slice %4 {offsets = [0, 0], sizes = [32, 36], strides = [1, 1]} : vector<128x36xf32> to vector<32x36xf32>
    %6 = vector.extract_strided_slice %4 {offsets = [32, 0], sizes = [32, 36], strides = [1, 1]} : vector<128x36xf32> to vector<32x36xf32>
    %7 = arith.maximumf %5, %6 : vector<32x36xf32>
    %8 = vector.extract_strided_slice %4 {offsets = [64, 0], sizes = [32, 36], strides = [1, 1]} : vector<128x36xf32> to vector<32x36xf32>
    %9 = vector.extract_strided_slice %4 {offsets = [96, 0], sizes = [32, 36], strides = [1, 1]} : vector<128x36xf32> to vector<32x36xf32>
    %10 = arith.maximumf %8, %9 : vector<32x36xf32>
    %11 = arith.maximumf %7, %10 : vector<32x36xf32>
    %c0_4 = arith.constant 0 : index
    %c0_5 = arith.constant 0 : index
    %12 = vector.load %arg3[%c0_4, %c0_5] : memref<32x1xf32, #tpu.memory_space<vmem>>, vector<32x1xf32>
    %13 = vector.broadcast %12 : vector<32x1xf32> to vector<32x36xf32>
    %14 = arith.addf %11, %13 : vector<32x36xf32>
    %cst_6 = arith.constant 0.000000e+00 : f32
    %15 = vector.broadcast %cst_6 : f32 to vector<32x36xf32>
    %16 = arith.maximumf %14, %15 : vector<32x36xf32>
    %c0_7 = arith.constant 0 : index
    %c0_8 = arith.constant 0 : index
    %c0_9 = arith.constant 0 : index
    %17 = vector.load %arg4[%c0_7, %c0_8, %c0_9] : memref<9x16x8xbf16, #tpu.memory_space<vmem>>, vector<1x16x8xbf16>
    %18 = vector.shape_cast %17 : vector<1x16x8xbf16> to vector<16x8xbf16>
    %c1 = arith.constant 1 : index
    %c0_10 = arith.constant 0 : index
    %c0_11 = arith.constant 0 : index
    %19 = vector.load %arg4[%c1, %c0_10, %c0_11] : memref<9x16x8xbf16, #tpu.memory_space<vmem>>, vector<1x16x8xbf16>
    %20 = vector.shape_cast %19 : vector<1x16x8xbf16> to vector<16x8xbf16>
    %c2 = arith.constant 2 : index
    %c0_12 = arith.constant 0 : index
    %c0_13 = arith.constant 0 : index
    %21 = vector.load %arg4[%c2, %c0_12, %c0_13] : memref<9x16x8xbf16, #tpu.memory_space<vmem>>, vector<1x16x8xbf16>
    %22 = vector.shape_cast %21 : vector<1x16x8xbf16> to vector<16x8xbf16>
    %c3 = arith.constant 3 : index
    %c0_14 = arith.constant 0 : index
    %c0_15 = arith.constant 0 : index
    %23 = vector.load %arg4[%c3, %c0_14, %c0_15] : memref<9x16x8xbf16, #tpu.memory_space<vmem>>, vector<1x16x8xbf16>
    %24 = vector.shape_cast %23 : vector<1x16x8xbf16> to vector<16x8xbf16>
    %c4 = arith.constant 4 : index
    %c0_16 = arith.constant 0 : index
    %c0_17 = arith.constant 0 : index
    %25 = vector.load %arg4[%c4, %c0_16, %c0_17] : memref<9x16x8xbf16, #tpu.memory_space<vmem>>, vector<1x16x8xbf16>
    %26 = vector.shape_cast %25 : vector<1x16x8xbf16> to vector<16x8xbf16>
    %c5 = arith.constant 5 : index
    %c0_18 = arith.constant 0 : index
    %c0_19 = arith.constant 0 : index
    %27 = vector.load %arg4[%c5, %c0_18, %c0_19] : memref<9x16x8xbf16, #tpu.memory_space<vmem>>, vector<1x16x8xbf16>
    %28 = vector.shape_cast %27 : vector<1x16x8xbf16> to vector<16x8xbf16>
    %c6 = arith.constant 6 : index
    %c0_20 = arith.constant 0 : index
    %c0_21 = arith.constant 0 : index
    %29 = vector.load %arg4[%c6, %c0_20, %c0_21] : memref<9x16x8xbf16, #tpu.memory_space<vmem>>, vector<1x16x8xbf16>
    %30 = vector.shape_cast %29 : vector<1x16x8xbf16> to vector<16x8xbf16>
    %c7 = arith.constant 7 : index
    %c0_22 = arith.constant 0 : index
    %c0_23 = arith.constant 0 : index
    %31 = vector.load %arg4[%c7, %c0_22, %c0_23] : memref<9x16x8xbf16, #tpu.memory_space<vmem>>, vector<1x16x8xbf16>
    %32 = vector.shape_cast %31 : vector<1x16x8xbf16> to vector<16x8xbf16>
    %c8 = arith.constant 8 : index
    %c0_24 = arith.constant 0 : index
    %c0_25 = arith.constant 0 : index
    %33 = vector.load %arg4[%c8, %c0_24, %c0_25] : memref<9x16x8xbf16, #tpu.memory_space<vmem>>, vector<1x16x8xbf16>
    %34 = vector.shape_cast %33 : vector<1x16x8xbf16> to vector<16x8xbf16>
    %35 = vector.extract_strided_slice %16 {offsets = [0, 0], sizes = [8, 36], strides = [1, 1]} : vector<32x36xf32> to vector<8x36xf32>
    %36 = vector.extract_strided_slice %35 {offsets = [0, 0], sizes = [8, 29], strides = [1, 1]} : vector<8x36xf32> to vector<8x29xf32>
    %37 = arith.truncf %36 : vector<8x29xf32> to vector<8x29xbf16>
    %cst_26 = arith.constant dense<0.000000e+00> : vector<16x29xf32>
    %38 = tpu.matmul %18, %37, %cst_26 {dimension_numbers = #tpu.dot_dimension_numbers<[1], [0], [0], [1], [0, 0, 1, 1], [], []>} : vector<16x8xbf16>, vector<8x29xbf16>, vector<16x29xf32> -> vector<16x29xf32>
    %39 = vector.extract_strided_slice %16 {offsets = [8, 0], sizes = [8, 36], strides = [1, 1]} : vector<32x36xf32> to vector<8x36xf32>
    %40 = vector.extract_strided_slice %39 {offsets = [0, 0], sizes = [8, 29], strides = [1, 1]} : vector<8x36xf32> to vector<8x29xf32>
    %41 = arith.truncf %40 : vector<8x29xf32> to vector<8x29xbf16>
    %cst_27 = arith.constant dense<0.000000e+00> : vector<16x29xf32>
    %42 = tpu.matmul %20, %41, %cst_27 {dimension_numbers = #tpu.dot_dimension_numbers<[1], [0], [0], [1], [0, 0, 1, 1], [], []>} : vector<16x8xbf16>, vector<8x29xbf16>, vector<16x29xf32> -> vector<16x29xf32>
    %43 = arith.addf %38, %42 : vector<16x29xf32>
    %44 = vector.extract_strided_slice %16 {offsets = [0, 0], sizes = [8, 36], strides = [1, 1]} : vector<32x36xf32> to vector<8x36xf32>
    %45 = vector.extract_strided_slice %44 {offsets = [0, 1], sizes = [8, 29], strides = [1, 1]} : vector<8x36xf32> to vector<8x29xf32>
    %46 = arith.truncf %45 : vector<8x29xf32> to vector<8x29xbf16>
    %cst_28 = arith.constant dense<0.000000e+00> : vector<16x29xf32>
    %47 = tpu.matmul %22, %46, %cst_28 {dimension_numbers = #tpu.dot_dimension_numbers<[1], [0], [0], [1], [0, 0, 1, 1], [], []>} : vector<16x8xbf16>, vector<8x29xbf16>, vector<16x29xf32> -> vector<16x29xf32>
    %48 = arith.addf %43, %47 : vector<16x29xf32>
    %49 = vector.extract_strided_slice %16 {offsets = [16, 0], sizes = [8, 36], strides = [1, 1]} : vector<32x36xf32> to vector<8x36xf32>
    %50 = vector.extract_strided_slice %49 {offsets = [0, 0], sizes = [8, 29], strides = [1, 1]} : vector<8x36xf32> to vector<8x29xf32>
    %51 = arith.truncf %50 : vector<8x29xf32> to vector<8x29xbf16>
    %cst_29 = arith.constant dense<0.000000e+00> : vector<16x29xf32>
    %52 = tpu.matmul %24, %51, %cst_29 {dimension_numbers = #tpu.dot_dimension_numbers<[1], [0], [0], [1], [0, 0, 1, 1], [], []>} : vector<16x8xbf16>, vector<8x29xbf16>, vector<16x29xf32> -> vector<16x29xf32>
    %53 = arith.addf %48, %52 : vector<16x29xf32>
    %54 = vector.extract_strided_slice %16 {offsets = [24, 0], sizes = [8, 36], strides = [1, 1]} : vector<32x36xf32> to vector<8x36xf32>
    %55 = vector.extract_strided_slice %54 {offsets = [0, 0], sizes = [8, 29], strides = [1, 1]} : vector<8x36xf32> to vector<8x29xf32>
    %56 = arith.truncf %55 : vector<8x29xf32> to vector<8x29xbf16>
    %cst_30 = arith.constant dense<0.000000e+00> : vector<16x29xf32>
    %57 = tpu.matmul %26, %56, %cst_30 {dimension_numbers = #tpu.dot_dimension_numbers<[1], [0], [0], [1], [0, 0, 1, 1], [], []>} : vector<16x8xbf16>, vector<8x29xbf16>, vector<16x29xf32> -> vector<16x29xf32>
    %58 = arith.addf %53, %57 : vector<16x29xf32>
    %59 = vector.extract_strided_slice %16 {offsets = [16, 0], sizes = [8, 36], strides = [1, 1]} : vector<32x36xf32> to vector<8x36xf32>
    %60 = vector.extract_strided_slice %59 {offsets = [0, 1], sizes = [8, 29], strides = [1, 1]} : vector<8x36xf32> to vector<8x29xf32>
    %61 = arith.truncf %60 : vector<8x29xf32> to vector<8x29xbf16>
    %cst_31 = arith.constant dense<0.000000e+00> : vector<16x29xf32>
    %62 = tpu.matmul %28, %61, %cst_31 {dimension_numbers = #tpu.dot_dimension_numbers<[1], [0], [0], [1], [0, 0, 1, 1], [], []>} : vector<16x8xbf16>, vector<8x29xbf16>, vector<16x29xf32> -> vector<16x29xf32>
    %63 = arith.addf %58, %62 : vector<16x29xf32>
    %64 = vector.extract_strided_slice %16 {offsets = [0, 0], sizes = [8, 36], strides = [1, 1]} : vector<32x36xf32> to vector<8x36xf32>
    %65 = vector.extract_strided_slice %64 {offsets = [0, 6], sizes = [8, 29], strides = [1, 1]} : vector<8x36xf32> to vector<8x29xf32>
    %66 = arith.truncf %65 : vector<8x29xf32> to vector<8x29xbf16>
    %cst_32 = arith.constant dense<0.000000e+00> : vector<16x29xf32>
    %67 = tpu.matmul %30, %66, %cst_32 {dimension_numbers = #tpu.dot_dimension_numbers<[1], [0], [0], [1], [0, 0, 1, 1], [], []>} : vector<16x8xbf16>, vector<8x29xbf16>, vector<16x29xf32> -> vector<16x29xf32>
    %68 = arith.addf %63, %67 : vector<16x29xf32>
    %69 = vector.extract_strided_slice %16 {offsets = [8, 0], sizes = [8, 36], strides = [1, 1]} : vector<32x36xf32> to vector<8x36xf32>
    %70 = vector.extract_strided_slice %69 {offsets = [0, 6], sizes = [8, 29], strides = [1, 1]} : vector<8x36xf32> to vector<8x29xf32>
    %71 = arith.truncf %70 : vector<8x29xf32> to vector<8x29xbf16>
    %cst_33 = arith.constant dense<0.000000e+00> : vector<16x29xf32>
    %72 = tpu.matmul %32, %71, %cst_33 {dimension_numbers = #tpu.dot_dimension_numbers<[1], [0], [0], [1], [0, 0, 1, 1], [], []>} : vector<16x8xbf16>, vector<8x29xbf16>, vector<16x29xf32> -> vector<16x29xf32>
    %73 = arith.addf %68, %72 : vector<16x29xf32>
    %74 = vector.extract_strided_slice %16 {offsets = [0, 0], sizes = [8, 36], strides = [1, 1]} : vector<32x36xf32> to vector<8x36xf32>
    %75 = vector.extract_strided_slice %74 {offsets = [0, 7], sizes = [8, 29], strides = [1, 1]} : vector<8x36xf32> to vector<8x29xf32>
    %76 = arith.truncf %75 : vector<8x29xf32> to vector<8x29xbf16>
    %cst_34 = arith.constant dense<0.000000e+00> : vector<16x29xf32>
    %77 = tpu.matmul %34, %76, %cst_34 {dimension_numbers = #tpu.dot_dimension_numbers<[1], [0], [0], [1], [0, 0, 1, 1], [], []>} : vector<16x8xbf16>, vector<8x29xbf16>, vector<16x29xf32> -> vector<16x29xf32>
    %78 = arith.addf %73, %77 : vector<16x29xf32>
    %cst_35 = arith.constant dense<0.000000e+00> : vector<16x29xf32>
    %79 = tpu.matmul %18, %41, %cst_35 {dimension_numbers = #tpu.dot_dimension_numbers<[1], [0], [0], [1], [0, 0, 1, 1], [], []>} : vector<16x8xbf16>, vector<8x29xbf16>, vector<16x29xf32> -> vector<16x29xf32>
    %cst_36 = arith.constant dense<0.000000e+00> : vector<16x29xf32>
    %80 = tpu.matmul %20, %46, %cst_36 {dimension_numbers = #tpu.dot_dimension_numbers<[1], [0], [0], [1], [0, 0, 1, 1], [], []>} : vector<16x8xbf16>, vector<8x29xbf16>, vector<16x29xf32> -> vector<16x29xf32>
    %81 = arith.addf %79, %80 : vector<16x29xf32>
    %82 = vector.extract_strided_slice %16 {offsets = [8, 0], sizes = [8, 36], strides = [1, 1]} : vector<32x36xf32> to vector<8x36xf32>
    %83 = vector.extract_strided_slice %82 {offsets = [0, 1], sizes = [8, 29], strides = [1, 1]} : vector<8x36xf32> to vector<8x29xf32>
    %84 = arith.truncf %83 : vector<8x29xf32> to vector<8x29xbf16>
    %cst_37 = arith.constant dense<0.000000e+00> : vector<16x29xf32>
    %85 = tpu.matmul %22, %84, %cst_37 {dimension_numbers = #tpu.dot_dimension_numbers<[1], [0], [0], [1], [0, 0, 1, 1], [], []>} : vector<16x8xbf16>, vector<8x29xbf16>, vector<16x29xf32> -> vector<16x29xf32>
    %86 = arith.addf %81, %85 : vector<16x29xf32>
    %cst_38 = arith.constant dense<0.000000e+00> : vector<16x29xf32>
    %87 = tpu.matmul %24, %56, %cst_38 {dimension_numbers = #tpu.dot_dimension_numbers<[1], [0], [0], [1], [0, 0, 1, 1], [], []>} : vector<16x8xbf16>, vector<8x29xbf16>, vector<16x29xf32> -> vector<16x29xf32>
    %88 = arith.addf %86, %87 : vector<16x29xf32>
    %cst_39 = arith.constant dense<0.000000e+00> : vector<16x29xf32>
    %89 = tpu.matmul %26, %61, %cst_39 {dimension_numbers = #tpu.dot_dimension_numbers<[1], [0], [0], [1], [0, 0, 1, 1], [], []>} : vector<16x8xbf16>, vector<8x29xbf16>, vector<16x29xf32> -> vector<16x29xf32>
    %90 = arith.addf %88, %89 : vector<16x29xf32>
    %91 = vector.extract_strided_slice %16 {offsets = [24, 0], sizes = [8, 36], strides = [1, 1]} : vector<32x36xf32> to vector<8x36xf32>
    %92 = vector.extract_strided_slice %91 {offsets = [0, 1], sizes = [8, 29], strides = [1, 1]} : vector<8x36xf32> to vector<8x29xf32>
    %93 = arith.truncf %92 : vector<8x29xf32> to vector<8x29xbf16>
    %cst_40 = arith.constant dense<0.000000e+00> : vector<16x29xf32>
    %94 = tpu.matmul %28, %93, %cst_40 {dimension_numbers = #tpu.dot_dimension_numbers<[1], [0], [0], [1], [0, 0, 1, 1], [], []>} : vector<16x8xbf16>, vector<8x29xbf16>, vector<16x29xf32> -> vector<16x29xf32>
    %95 = arith.addf %90, %94 : vector<16x29xf32>
    %cst_41 = arith.constant dense<0.000000e+00> : vector<16x29xf32>
    %96 = tpu.matmul %30, %71, %cst_41 {dimension_numbers = #tpu.dot_dimension_numbers<[1], [0], [0], [1], [0, 0, 1, 1], [], []>} : vector<16x8xbf16>, vector<8x29xbf16>, vector<16x29xf32> -> vector<16x29xf32>
    %97 = arith.addf %95, %96 : vector<16x29xf32>
    %cst_42 = arith.constant dense<0.000000e+00> : vector<16x29xf32>
    %98 = tpu.matmul %32, %76, %cst_42 {dimension_numbers = #tpu.dot_dimension_numbers<[1], [0], [0], [1], [0, 0, 1, 1], [], []>} : vector<16x8xbf16>, vector<8x29xbf16>, vector<16x29xf32> -> vector<16x29xf32>
    %99 = arith.addf %97, %98 : vector<16x29xf32>
    %100 = vector.extract_strided_slice %16 {offsets = [8, 0], sizes = [8, 36], strides = [1, 1]} : vector<32x36xf32> to vector<8x36xf32>
    %101 = vector.extract_strided_slice %100 {offsets = [0, 7], sizes = [8, 29], strides = [1, 1]} : vector<8x36xf32> to vector<8x29xf32>
    %102 = arith.truncf %101 : vector<8x29xf32> to vector<8x29xbf16>
    %cst_43 = arith.constant dense<0.000000e+00> : vector<16x29xf32>
    %103 = tpu.matmul %34, %102, %cst_43 {dimension_numbers = #tpu.dot_dimension_numbers<[1], [0], [0], [1], [0, 0, 1, 1], [], []>} : vector<16x8xbf16>, vector<8x29xbf16>, vector<16x29xf32> -> vector<16x29xf32>
    %104 = arith.addf %99, %103 : vector<16x29xf32>
    %105 = arith.maximumf %78, %104 : vector<16x29xf32>
    %cst_44 = arith.constant dense<0.000000e+00> : vector<16x29xf32>
    %106 = tpu.matmul %18, %51, %cst_44 {dimension_numbers = #tpu.dot_dimension_numbers<[1], [0], [0], [1], [0, 0, 1, 1], [], []>} : vector<16x8xbf16>, vector<8x29xbf16>, vector<16x29xf32> -> vector<16x29xf32>
    %cst_45 = arith.constant dense<0.000000e+00> : vector<16x29xf32>
    %107 = tpu.matmul %20, %56, %cst_45 {dimension_numbers = #tpu.dot_dimension_numbers<[1], [0], [0], [1], [0, 0, 1, 1], [], []>} : vector<16x8xbf16>, vector<8x29xbf16>, vector<16x29xf32> -> vector<16x29xf32>
    %108 = arith.addf %106, %107 : vector<16x29xf32>
    %cst_46 = arith.constant dense<0.000000e+00> : vector<16x29xf32>
    %109 = tpu.matmul %22, %61, %cst_46 {dimension_numbers = #tpu.dot_dimension_numbers<[1], [0], [0], [1], [0, 0, 1, 1], [], []>} : vector<16x8xbf16>, vector<8x29xbf16>, vector<16x29xf32> -> vector<16x29xf32>
    %110 = arith.addf %108, %109 : vector<16x29xf32>
    %cst_47 = arith.constant dense<0.000000e+00> : vector<16x29xf32>
    %111 = tpu.matmul %24, %66, %cst_47 {dimension_numbers = #tpu.dot_dimension_numbers<[1], [0], [0], [1], [0, 0, 1, 1], [], []>} : vector<16x8xbf16>, vector<8x29xbf16>, vector<16x29xf32> -> vector<16x29xf32>
    %112 = arith.addf %110, %111 : vector<16x29xf32>
    %cst_48 = arith.constant dense<0.000000e+00> : vector<16x29xf32>
    %113 = tpu.matmul %26, %71, %cst_48 {dimension_numbers = #tpu.dot_dimension_numbers<[1], [0], [0], [1], [0, 0, 1, 1], [], []>} : vector<16x8xbf16>, vector<8x29xbf16>, vector<16x29xf32> -> vector<16x29xf32>
    %114 = arith.addf %112, %113 : vector<16x29xf32>
    %cst_49 = arith.constant dense<0.000000e+00> : vector<16x29xf32>
    %115 = tpu.matmul %28, %76, %cst_49 {dimension_numbers = #tpu.dot_dimension_numbers<[1], [0], [0], [1], [0, 0, 1, 1], [], []>} : vector<16x8xbf16>, vector<8x29xbf16>, vector<16x29xf32> -> vector<16x29xf32>
    %116 = arith.addf %114, %115 : vector<16x29xf32>
    %117 = vector.extract_strided_slice %16 {offsets = [16, 0], sizes = [8, 36], strides = [1, 1]} : vector<32x36xf32> to vector<8x36xf32>
    %118 = vector.extract_strided_slice %117 {offsets = [0, 6], sizes = [8, 29], strides = [1, 1]} : vector<8x36xf32> to vector<8x29xf32>
    %119 = arith.truncf %118 : vector<8x29xf32> to vector<8x29xbf16>
    %cst_50 = arith.constant dense<0.000000e+00> : vector<16x29xf32>
    %120 = tpu.matmul %30, %119, %cst_50 {dimension_numbers = #tpu.dot_dimension_numbers<[1], [0], [0], [1], [0, 0, 1, 1], [], []>} : vector<16x8xbf16>, vector<8x29xbf16>, vector<16x29xf32> -> vector<16x29xf32>
    %121 = arith.addf %116, %120 : vector<16x29xf32>
    %122 = vector.extract_strided_slice %16 {offsets = [24, 0], sizes = [8, 36], strides = [1, 1]} : vector<32x36xf32> to vector<8x36xf32>
    %123 = vector.extract_strided_slice %122 {offsets = [0, 6], sizes = [8, 29], strides = [1, 1]} : vector<8x36xf32> to vector<8x29xf32>
    %124 = arith.truncf %123 : vector<8x29xf32> to vector<8x29xbf16>
    %cst_51 = arith.constant dense<0.000000e+00> : vector<16x29xf32>
    %125 = tpu.matmul %32, %124, %cst_51 {dimension_numbers = #tpu.dot_dimension_numbers<[1], [0], [0], [1], [0, 0, 1, 1], [], []>} : vector<16x8xbf16>, vector<8x29xbf16>, vector<16x29xf32> -> vector<16x29xf32>
    %126 = arith.addf %121, %125 : vector<16x29xf32>
    %127 = vector.extract_strided_slice %16 {offsets = [16, 0], sizes = [8, 36], strides = [1, 1]} : vector<32x36xf32> to vector<8x36xf32>
    %128 = vector.extract_strided_slice %127 {offsets = [0, 7], sizes = [8, 29], strides = [1, 1]} : vector<8x36xf32> to vector<8x29xf32>
    %129 = arith.truncf %128 : vector<8x29xf32> to vector<8x29xbf16>
    %cst_52 = arith.constant dense<0.000000e+00> : vector<16x29xf32>
    %130 = tpu.matmul %34, %129, %cst_52 {dimension_numbers = #tpu.dot_dimension_numbers<[1], [0], [0], [1], [0, 0, 1, 1], [], []>} : vector<16x8xbf16>, vector<8x29xbf16>, vector<16x29xf32> -> vector<16x29xf32>
    %131 = arith.addf %126, %130 : vector<16x29xf32>
    %132 = arith.maximumf %105, %131 : vector<16x29xf32>
    %cst_53 = arith.constant dense<0.000000e+00> : vector<16x29xf32>
    %133 = tpu.matmul %18, %56, %cst_53 {dimension_numbers = #tpu.dot_dimension_numbers<[1], [0], [0], [1], [0, 0, 1, 1], [], []>} : vector<16x8xbf16>, vector<8x29xbf16>, vector<16x29xf32> -> vector<16x29xf32>
    %cst_54 = arith.constant dense<0.000000e+00> : vector<16x29xf32>
    %134 = tpu.matmul %20, %61, %cst_54 {dimension_numbers = #tpu.dot_dimension_numbers<[1], [0], [0], [1], [0, 0, 1, 1], [], []>} : vector<16x8xbf16>, vector<8x29xbf16>, vector<16x29xf32> -> vector<16x29xf32>
    %135 = arith.addf %133, %134 : vector<16x29xf32>
    %cst_55 = arith.constant dense<0.000000e+00> : vector<16x29xf32>
    %136 = tpu.matmul %22, %93, %cst_55 {dimension_numbers = #tpu.dot_dimension_numbers<[1], [0], [0], [1], [0, 0, 1, 1], [], []>} : vector<16x8xbf16>, vector<8x29xbf16>, vector<16x29xf32> -> vector<16x29xf32>
    %137 = arith.addf %135, %136 : vector<16x29xf32>
    %cst_56 = arith.constant dense<0.000000e+00> : vector<16x29xf32>
    %138 = tpu.matmul %24, %71, %cst_56 {dimension_numbers = #tpu.dot_dimension_numbers<[1], [0], [0], [1], [0, 0, 1, 1], [], []>} : vector<16x8xbf16>, vector<8x29xbf16>, vector<16x29xf32> -> vector<16x29xf32>
    %139 = arith.addf %137, %138 : vector<16x29xf32>
    %cst_57 = arith.constant dense<0.000000e+00> : vector<16x29xf32>
    %140 = tpu.matmul %26, %76, %cst_57 {dimension_numbers = #tpu.dot_dimension_numbers<[1], [0], [0], [1], [0, 0, 1, 1], [], []>} : vector<16x8xbf16>, vector<8x29xbf16>, vector<16x29xf32> -> vector<16x29xf32>
    %141 = arith.addf %139, %140 : vector<16x29xf32>
    %cst_58 = arith.constant dense<0.000000e+00> : vector<16x29xf32>
    %142 = tpu.matmul %28, %102, %cst_58 {dimension_numbers = #tpu.dot_dimension_numbers<[1], [0], [0], [1], [0, 0, 1, 1], [], []>} : vector<16x8xbf16>, vector<8x29xbf16>, vector<16x29xf32> -> vector<16x29xf32>
    %143 = arith.addf %141, %142 : vector<16x29xf32>
    %cst_59 = arith.constant dense<0.000000e+00> : vector<16x29xf32>
    %144 = tpu.matmul %30, %124, %cst_59 {dimension_numbers = #tpu.dot_dimension_numbers<[1], [0], [0], [1], [0, 0, 1, 1], [], []>} : vector<16x8xbf16>, vector<8x29xbf16>, vector<16x29xf32> -> vector<16x29xf32>
    %145 = arith.addf %143, %144 : vector<16x29xf32>
    %cst_60 = arith.constant dense<0.000000e+00> : vector<16x29xf32>
    %146 = tpu.matmul %32, %129, %cst_60 {dimension_numbers = #tpu.dot_dimension_numbers<[1], [0], [0], [1], [0, 0, 1, 1], [], []>} : vector<16x8xbf16>, vector<8x29xbf16>, vector<16x29xf32> -> vector<16x29xf32>
    %147 = arith.addf %145, %146 : vector<16x29xf32>
    %148 = vector.extract_strided_slice %16 {offsets = [24, 0], sizes = [8, 36], strides = [1, 1]} : vector<32x36xf32> to vector<8x36xf32>
    %149 = vector.extract_strided_slice %148 {offsets = [0, 7], sizes = [8, 29], strides = [1, 1]} : vector<8x36xf32> to vector<8x29xf32>
    %150 = arith.truncf %149 : vector<8x29xf32> to vector<8x29xbf16>
    %cst_61 = arith.constant dense<0.000000e+00> : vector<16x29xf32>
    %151 = tpu.matmul %34, %150, %cst_61 {dimension_numbers = #tpu.dot_dimension_numbers<[1], [0], [0], [1], [0, 0, 1, 1], [], []>} : vector<16x8xbf16>, vector<8x29xbf16>, vector<16x29xf32> -> vector<16x29xf32>
    %152 = arith.addf %147, %151 : vector<16x29xf32>
    %153 = arith.maximumf %132, %152 : vector<16x29xf32>
    %c0_62 = arith.constant 0 : index
    %c0_63 = arith.constant 0 : index
    %154 = vector.load %arg5[%c0_62, %c0_63] : memref<16x1xf32, #tpu.memory_space<vmem>>, vector<16x1xf32>
    %155 = vector.broadcast %154 : vector<16x1xf32> to vector<16x29xf32>
    %156 = arith.addf %153, %155 : vector<16x29xf32>
    %cst_64 = arith.constant 0.000000e+00 : f32
    %157 = vector.broadcast %cst_64 : f32 to vector<16x29xf32>
    %158 = arith.maximumf %156, %157 : vector<16x29xf32>
    %c0_65 = arith.constant 0 : index
    %c0_66 = arith.constant 0 : index
    %159 = vector.load %arg7[%c0_65, %c0_66] : memref<1x120xf32, #tpu.memory_space<vmem>>, vector<1x120xf32>
    %160 = vector.extract_strided_slice %158 {offsets = [0, 0], sizes = [1, 29], strides = [1, 1]} : vector<16x29xf32> to vector<1x29xf32>
    %161 = arith.truncf %160 : vector<1x29xf32> to vector<1x29xbf16>
    %c0_67 = arith.constant 0 : index
    %c0_68 = arith.constant 0 : index
    %c0_69 = arith.constant 0 : index
    %162 = vector.load %arg6[%c0_67, %c0_68, %c0_69] : memref<16x29x120xbf16, #tpu.memory_space<vmem>>, vector<1x29x120xbf16>
    %163 = vector.shape_cast %162 : vector<1x29x120xbf16> to vector<29x120xbf16>
    %cst_70 = arith.constant dense<0.000000e+00> : vector<1x120xf32>
    %164 = tpu.matmul %161, %163, %cst_70 {dimension_numbers = #tpu.dot_dimension_numbers<[1], [0], [0], [1], [0, 0, 1, 1], [], []>} : vector<1x29xbf16>, vector<29x120xbf16>, vector<1x120xf32> -> vector<1x120xf32>
    %165 = arith.addf %159, %164 : vector<1x120xf32>
    %166 = vector.extract_strided_slice %158 {offsets = [1, 0], sizes = [1, 29], strides = [1, 1]} : vector<16x29xf32> to vector<1x29xf32>
    %167 = arith.truncf %166 : vector<1x29xf32> to vector<1x29xbf16>
    %c1_71 = arith.constant 1 : index
    %c0_72 = arith.constant 0 : index
    %c0_73 = arith.constant 0 : index
    %168 = vector.load %arg6[%c1_71, %c0_72, %c0_73] : memref<16x29x120xbf16, #tpu.memory_space<vmem>>, vector<1x29x120xbf16>
    %169 = vector.shape_cast %168 : vector<1x29x120xbf16> to vector<29x120xbf16>
    %cst_74 = arith.constant dense<0.000000e+00> : vector<1x120xf32>
    %170 = tpu.matmul %167, %169, %cst_74 {dimension_numbers = #tpu.dot_dimension_numbers<[1], [0], [0], [1], [0, 0, 1, 1], [], []>} : vector<1x29xbf16>, vector<29x120xbf16>, vector<1x120xf32> -> vector<1x120xf32>
    %171 = arith.addf %165, %170 : vector<1x120xf32>
    %172 = vector.extract_strided_slice %158 {offsets = [2, 0], sizes = [1, 29], strides = [1, 1]} : vector<16x29xf32> to vector<1x29xf32>
    %173 = arith.truncf %172 : vector<1x29xf32> to vector<1x29xbf16>
    %c2_75 = arith.constant 2 : index
    %c0_76 = arith.constant 0 : index
    %c0_77 = arith.constant 0 : index
    %174 = vector.load %arg6[%c2_75, %c0_76, %c0_77] : memref<16x29x120xbf16, #tpu.memory_space<vmem>>, vector<1x29x120xbf16>
    %175 = vector.shape_cast %174 : vector<1x29x120xbf16> to vector<29x120xbf16>
    %cst_78 = arith.constant dense<0.000000e+00> : vector<1x120xf32>
    %176 = tpu.matmul %173, %175, %cst_78 {dimension_numbers = #tpu.dot_dimension_numbers<[1], [0], [0], [1], [0, 0, 1, 1], [], []>} : vector<1x29xbf16>, vector<29x120xbf16>, vector<1x120xf32> -> vector<1x120xf32>
    %177 = arith.addf %171, %176 : vector<1x120xf32>
    %178 = vector.extract_strided_slice %158 {offsets = [3, 0], sizes = [1, 29], strides = [1, 1]} : vector<16x29xf32> to vector<1x29xf32>
    %179 = arith.truncf %178 : vector<1x29xf32> to vector<1x29xbf16>
    %c3_79 = arith.constant 3 : index
    %c0_80 = arith.constant 0 : index
    %c0_81 = arith.constant 0 : index
    %180 = vector.load %arg6[%c3_79, %c0_80, %c0_81] : memref<16x29x120xbf16, #tpu.memory_space<vmem>>, vector<1x29x120xbf16>
    %181 = vector.shape_cast %180 : vector<1x29x120xbf16> to vector<29x120xbf16>
    %cst_82 = arith.constant dense<0.000000e+00> : vector<1x120xf32>
    %182 = tpu.matmul %179, %181, %cst_82 {dimension_numbers = #tpu.dot_dimension_numbers<[1], [0], [0], [1], [0, 0, 1, 1], [], []>} : vector<1x29xbf16>, vector<29x120xbf16>, vector<1x120xf32> -> vector<1x120xf32>
    %183 = arith.addf %177, %182 : vector<1x120xf32>
    %184 = vector.extract_strided_slice %158 {offsets = [4, 0], sizes = [1, 29], strides = [1, 1]} : vector<16x29xf32> to vector<1x29xf32>
    %185 = arith.truncf %184 : vector<1x29xf32> to vector<1x29xbf16>
    %c4_83 = arith.constant 4 : index
    %c0_84 = arith.constant 0 : index
    %c0_85 = arith.constant 0 : index
    %186 = vector.load %arg6[%c4_83, %c0_84, %c0_85] : memref<16x29x120xbf16, #tpu.memory_space<vmem>>, vector<1x29x120xbf16>
    %187 = vector.shape_cast %186 : vector<1x29x120xbf16> to vector<29x120xbf16>
    %cst_86 = arith.constant dense<0.000000e+00> : vector<1x120xf32>
    %188 = tpu.matmul %185, %187, %cst_86 {dimension_numbers = #tpu.dot_dimension_numbers<[1], [0], [0], [1], [0, 0, 1, 1], [], []>} : vector<1x29xbf16>, vector<29x120xbf16>, vector<1x120xf32> -> vector<1x120xf32>
    %189 = arith.addf %183, %188 : vector<1x120xf32>
    %190 = vector.extract_strided_slice %158 {offsets = [5, 0], sizes = [1, 29], strides = [1, 1]} : vector<16x29xf32> to vector<1x29xf32>
    %191 = arith.truncf %190 : vector<1x29xf32> to vector<1x29xbf16>
    %c5_87 = arith.constant 5 : index
    %c0_88 = arith.constant 0 : index
    %c0_89 = arith.constant 0 : index
    %192 = vector.load %arg6[%c5_87, %c0_88, %c0_89] : memref<16x29x120xbf16, #tpu.memory_space<vmem>>, vector<1x29x120xbf16>
    %193 = vector.shape_cast %192 : vector<1x29x120xbf16> to vector<29x120xbf16>
    %cst_90 = arith.constant dense<0.000000e+00> : vector<1x120xf32>
    %194 = tpu.matmul %191, %193, %cst_90 {dimension_numbers = #tpu.dot_dimension_numbers<[1], [0], [0], [1], [0, 0, 1, 1], [], []>} : vector<1x29xbf16>, vector<29x120xbf16>, vector<1x120xf32> -> vector<1x120xf32>
    %195 = arith.addf %189, %194 : vector<1x120xf32>
    %196 = vector.extract_strided_slice %158 {offsets = [6, 0], sizes = [1, 29], strides = [1, 1]} : vector<16x29xf32> to vector<1x29xf32>
    %197 = arith.truncf %196 : vector<1x29xf32> to vector<1x29xbf16>
    %c6_91 = arith.constant 6 : index
    %c0_92 = arith.constant 0 : index
    %c0_93 = arith.constant 0 : index
    %198 = vector.load %arg6[%c6_91, %c0_92, %c0_93] : memref<16x29x120xbf16, #tpu.memory_space<vmem>>, vector<1x29x120xbf16>
    %199 = vector.shape_cast %198 : vector<1x29x120xbf16> to vector<29x120xbf16>
    %cst_94 = arith.constant dense<0.000000e+00> : vector<1x120xf32>
    %200 = tpu.matmul %197, %199, %cst_94 {dimension_numbers = #tpu.dot_dimension_numbers<[1], [0], [0], [1], [0, 0, 1, 1], [], []>} : vector<1x29xbf16>, vector<29x120xbf16>, vector<1x120xf32> -> vector<1x120xf32>
    %201 = arith.addf %195, %200 : vector<1x120xf32>
    %202 = vector.extract_strided_slice %158 {offsets = [7, 0], sizes = [1, 29], strides = [1, 1]} : vector<16x29xf32> to vector<1x29xf32>
    %203 = arith.truncf %202 : vector<1x29xf32> to vector<1x29xbf16>
    %c7_95 = arith.constant 7 : index
    %c0_96 = arith.constant 0 : index
    %c0_97 = arith.constant 0 : index
    %204 = vector.load %arg6[%c7_95, %c0_96, %c0_97] : memref<16x29x120xbf16, #tpu.memory_space<vmem>>, vector<1x29x120xbf16>
    %205 = vector.shape_cast %204 : vector<1x29x120xbf16> to vector<29x120xbf16>
    %cst_98 = arith.constant dense<0.000000e+00> : vector<1x120xf32>
    %206 = tpu.matmul %203, %205, %cst_98 {dimension_numbers = #tpu.dot_dimension_numbers<[1], [0], [0], [1], [0, 0, 1, 1], [], []>} : vector<1x29xbf16>, vector<29x120xbf16>, vector<1x120xf32> -> vector<1x120xf32>
    %207 = arith.addf %201, %206 : vector<1x120xf32>
    %208 = vector.extract_strided_slice %158 {offsets = [8, 0], sizes = [1, 29], strides = [1, 1]} : vector<16x29xf32> to vector<1x29xf32>
    %209 = arith.truncf %208 : vector<1x29xf32> to vector<1x29xbf16>
    %c8_99 = arith.constant 8 : index
    %c0_100 = arith.constant 0 : index
    %c0_101 = arith.constant 0 : index
    %210 = vector.load %arg6[%c8_99, %c0_100, %c0_101] : memref<16x29x120xbf16, #tpu.memory_space<vmem>>, vector<1x29x120xbf16>
    %211 = vector.shape_cast %210 : vector<1x29x120xbf16> to vector<29x120xbf16>
    %cst_102 = arith.constant dense<0.000000e+00> : vector<1x120xf32>
    %212 = tpu.matmul %209, %211, %cst_102 {dimension_numbers = #tpu.dot_dimension_numbers<[1], [0], [0], [1], [0, 0, 1, 1], [], []>} : vector<1x29xbf16>, vector<29x120xbf16>, vector<1x120xf32> -> vector<1x120xf32>
    %213 = arith.addf %207, %212 : vector<1x120xf32>
    %214 = vector.extract_strided_slice %158 {offsets = [9, 0], sizes = [1, 29], strides = [1, 1]} : vector<16x29xf32> to vector<1x29xf32>
    %215 = arith.truncf %214 : vector<1x29xf32> to vector<1x29xbf16>
    %c9 = arith.constant 9 : index
    %c0_103 = arith.constant 0 : index
    %c0_104 = arith.constant 0 : index
    %216 = vector.load %arg6[%c9, %c0_103, %c0_104] : memref<16x29x120xbf16, #tpu.memory_space<vmem>>, vector<1x29x120xbf16>
    %217 = vector.shape_cast %216 : vector<1x29x120xbf16> to vector<29x120xbf16>
    %cst_105 = arith.constant dense<0.000000e+00> : vector<1x120xf32>
    %218 = tpu.matmul %215, %217, %cst_105 {dimension_numbers = #tpu.dot_dimension_numbers<[1], [0], [0], [1], [0, 0, 1, 1], [], []>} : vector<1x29xbf16>, vector<29x120xbf16>, vector<1x120xf32> -> vector<1x120xf32>
    %219 = arith.addf %213, %218 : vector<1x120xf32>
    %220 = vector.extract_strided_slice %158 {offsets = [10, 0], sizes = [1, 29], strides = [1, 1]} : vector<16x29xf32> to vector<1x29xf32>
    %221 = arith.truncf %220 : vector<1x29xf32> to vector<1x29xbf16>
    %c10 = arith.constant 10 : index
    %c0_106 = arith.constant 0 : index
    %c0_107 = arith.constant 0 : index
    %222 = vector.load %arg6[%c10, %c0_106, %c0_107] : memref<16x29x120xbf16, #tpu.memory_space<vmem>>, vector<1x29x120xbf16>
    %223 = vector.shape_cast %222 : vector<1x29x120xbf16> to vector<29x120xbf16>
    %cst_108 = arith.constant dense<0.000000e+00> : vector<1x120xf32>
    %224 = tpu.matmul %221, %223, %cst_108 {dimension_numbers = #tpu.dot_dimension_numbers<[1], [0], [0], [1], [0, 0, 1, 1], [], []>} : vector<1x29xbf16>, vector<29x120xbf16>, vector<1x120xf32> -> vector<1x120xf32>
    %225 = arith.addf %219, %224 : vector<1x120xf32>
    %226 = vector.extract_strided_slice %158 {offsets = [11, 0], sizes = [1, 29], strides = [1, 1]} : vector<16x29xf32> to vector<1x29xf32>
    %227 = arith.truncf %226 : vector<1x29xf32> to vector<1x29xbf16>
    %c11 = arith.constant 11 : index
    %c0_109 = arith.constant 0 : index
    %c0_110 = arith.constant 0 : index
    %228 = vector.load %arg6[%c11, %c0_109, %c0_110] : memref<16x29x120xbf16, #tpu.memory_space<vmem>>, vector<1x29x120xbf16>
    %229 = vector.shape_cast %228 : vector<1x29x120xbf16> to vector<29x120xbf16>
    %cst_111 = arith.constant dense<0.000000e+00> : vector<1x120xf32>
    %230 = tpu.matmul %227, %229, %cst_111 {dimension_numbers = #tpu.dot_dimension_numbers<[1], [0], [0], [1], [0, 0, 1, 1], [], []>} : vector<1x29xbf16>, vector<29x120xbf16>, vector<1x120xf32> -> vector<1x120xf32>
    %231 = arith.addf %225, %230 : vector<1x120xf32>
    %232 = vector.extract_strided_slice %158 {offsets = [12, 0], sizes = [1, 29], strides = [1, 1]} : vector<16x29xf32> to vector<1x29xf32>
    %233 = arith.truncf %232 : vector<1x29xf32> to vector<1x29xbf16>
    %c12 = arith.constant 12 : index
    %c0_112 = arith.constant 0 : index
    %c0_113 = arith.constant 0 : index
    %234 = vector.load %arg6[%c12, %c0_112, %c0_113] : memref<16x29x120xbf16, #tpu.memory_space<vmem>>, vector<1x29x120xbf16>
    %235 = vector.shape_cast %234 : vector<1x29x120xbf16> to vector<29x120xbf16>
    %cst_114 = arith.constant dense<0.000000e+00> : vector<1x120xf32>
    %236 = tpu.matmul %233, %235, %cst_114 {dimension_numbers = #tpu.dot_dimension_numbers<[1], [0], [0], [1], [0, 0, 1, 1], [], []>} : vector<1x29xbf16>, vector<29x120xbf16>, vector<1x120xf32> -> vector<1x120xf32>
    %237 = arith.addf %231, %236 : vector<1x120xf32>
    %238 = vector.extract_strided_slice %158 {offsets = [13, 0], sizes = [1, 29], strides = [1, 1]} : vector<16x29xf32> to vector<1x29xf32>
    %239 = arith.truncf %238 : vector<1x29xf32> to vector<1x29xbf16>
    %c13 = arith.constant 13 : index
    %c0_115 = arith.constant 0 : index
    %c0_116 = arith.constant 0 : index
    %240 = vector.load %arg6[%c13, %c0_115, %c0_116] : memref<16x29x120xbf16, #tpu.memory_space<vmem>>, vector<1x29x120xbf16>
    %241 = vector.shape_cast %240 : vector<1x29x120xbf16> to vector<29x120xbf16>
    %cst_117 = arith.constant dense<0.000000e+00> : vector<1x120xf32>
    %242 = tpu.matmul %239, %241, %cst_117 {dimension_numbers = #tpu.dot_dimension_numbers<[1], [0], [0], [1], [0, 0, 1, 1], [], []>} : vector<1x29xbf16>, vector<29x120xbf16>, vector<1x120xf32> -> vector<1x120xf32>
    %243 = arith.addf %237, %242 : vector<1x120xf32>
    %244 = vector.extract_strided_slice %158 {offsets = [14, 0], sizes = [1, 29], strides = [1, 1]} : vector<16x29xf32> to vector<1x29xf32>
    %245 = arith.truncf %244 : vector<1x29xf32> to vector<1x29xbf16>
    %c14 = arith.constant 14 : index
    %c0_118 = arith.constant 0 : index
    %c0_119 = arith.constant 0 : index
    %246 = vector.load %arg6[%c14, %c0_118, %c0_119] : memref<16x29x120xbf16, #tpu.memory_space<vmem>>, vector<1x29x120xbf16>
    %247 = vector.shape_cast %246 : vector<1x29x120xbf16> to vector<29x120xbf16>
    %cst_120 = arith.constant dense<0.000000e+00> : vector<1x120xf32>
    %248 = tpu.matmul %245, %247, %cst_120 {dimension_numbers = #tpu.dot_dimension_numbers<[1], [0], [0], [1], [0, 0, 1, 1], [], []>} : vector<1x29xbf16>, vector<29x120xbf16>, vector<1x120xf32> -> vector<1x120xf32>
    %249 = arith.addf %243, %248 : vector<1x120xf32>
    %250 = vector.extract_strided_slice %158 {offsets = [15, 0], sizes = [1, 29], strides = [1, 1]} : vector<16x29xf32> to vector<1x29xf32>
    %251 = arith.truncf %250 : vector<1x29xf32> to vector<1x29xbf16>
    %c15 = arith.constant 15 : index
    %c0_121 = arith.constant 0 : index
    %c0_122 = arith.constant 0 : index
    %252 = vector.load %arg6[%c15, %c0_121, %c0_122] : memref<16x29x120xbf16, #tpu.memory_space<vmem>>, vector<1x29x120xbf16>
    %253 = vector.shape_cast %252 : vector<1x29x120xbf16> to vector<29x120xbf16>
    %cst_123 = arith.constant dense<0.000000e+00> : vector<1x120xf32>
    %254 = tpu.matmul %251, %253, %cst_123 {dimension_numbers = #tpu.dot_dimension_numbers<[1], [0], [0], [1], [0, 0, 1, 1], [], []>} : vector<1x29xbf16>, vector<29x120xbf16>, vector<1x120xf32> -> vector<1x120xf32>
    %255 = arith.addf %249, %254 : vector<1x120xf32>
    %cst_124 = arith.constant 0.000000e+00 : f32
    %256 = vector.broadcast %cst_124 : f32 to vector<1x120xf32>
    %257 = arith.maximumf %255, %256 : vector<1x120xf32>
    %258 = arith.truncf %257 : vector<1x120xf32> to vector<1x120xbf16>
    %c0_125 = arith.constant 0 : index
    %c0_126 = arith.constant 0 : index
    %259 = vector.load %arg8[%c0_125, %c0_126] : memref<120x84xbf16, #tpu.memory_space<vmem>>, vector<120x84xbf16>
    %cst_127 = arith.constant dense<0.000000e+00> : vector<1x84xf32>
    %260 = tpu.matmul %258, %259, %cst_127 {dimension_numbers = #tpu.dot_dimension_numbers<[1], [0], [0], [1], [0, 0, 1, 1], [], []>} : vector<1x120xbf16>, vector<120x84xbf16>, vector<1x84xf32> -> vector<1x84xf32>
    %c0_128 = arith.constant 0 : index
    %c0_129 = arith.constant 0 : index
    %261 = vector.load %arg9[%c0_128, %c0_129] : memref<1x84xf32, #tpu.memory_space<vmem>>, vector<1x84xf32>
    %262 = arith.addf %260, %261 : vector<1x84xf32>
    %cst_130 = arith.constant 0.000000e+00 : f32
    %263 = vector.broadcast %cst_130 : f32 to vector<1x84xf32>
    %264 = arith.maximumf %262, %263 : vector<1x84xf32>
    %265 = arith.truncf %264 : vector<1x84xf32> to vector<1x84xbf16>
    %c0_131 = arith.constant 0 : index
    %c0_132 = arith.constant 0 : index
    %266 = vector.load %arg10[%c0_131, %c0_132] : memref<84x10xbf16, #tpu.memory_space<vmem>>, vector<84x10xbf16>
    %cst_133 = arith.constant dense<0.000000e+00> : vector<1x10xf32>
    %267 = tpu.matmul %265, %266, %cst_133 {dimension_numbers = #tpu.dot_dimension_numbers<[1], [0], [0], [1], [0, 0, 1, 1], [], []>} : vector<1x84xbf16>, vector<84x10xbf16>, vector<1x10xf32> -> vector<1x10xf32>
    %c0_134 = arith.constant 0 : index
    %c0_135 = arith.constant 0 : index
    %268 = vector.load %arg11[%c0_134, %c0_135] : memref<1x10xf32, #tpu.memory_space<vmem>>, vector<1x10xf32>
    %269 = arith.addf %267, %268 : vector<1x10xf32>
    %c0_136 = arith.constant 0 : index
    %c0_137 = arith.constant 0 : index
    %c0_138 = arith.constant 0 : index
    %270 = vector.load %arg12[%c0_136, %c0_137, %c0_138] : memref<1x1x10xf32, #tpu.memory_space<vmem>>, vector<1x1x10xf32>
    %271 = vector.shape_cast %270 : vector<1x1x10xf32> to vector<1x10xf32>
    %272 = vector.shape_cast %269 : vector<1x10xf32> to vector<1x1x10xf32>
    tpu.vector_store %arg12[%c0_136, %c0_137, %c0_138], %272 {strides = array<i32>} : memref<1x1x10xf32, #tpu.memory_space<vmem>>, vector<1x1x10xf32>,
    return
  }
  func.func @transform_0(%arg0: i32) -> (i32, i32, i32) {
    %c0_i32 = arith.constant 0 : i32
    %c0_i32_0 = arith.constant 0 : i32
    %c0_i32_1 = arith.constant 0 : i32
    return %arg0, %c0_i32, %c0_i32_0 : i32, i32, i32
  }
  func.func @transform_1(%arg0: i32) -> (i32, i32) {
    %c0_i32 = arith.constant 0 : i32
    %c0_i32_0 = arith.constant 0 : i32
    %c0_i32_1 = arith.constant 0 : i32
    return %c0_i32, %c0_i32_0 : i32, i32
  }
  func.func @transform_2(%arg0: i32) -> (i32, i32) {
    %c0_i32 = arith.constant 0 : i32
    %c0_i32_0 = arith.constant 0 : i32
    %c0_i32_1 = arith.constant 0 : i32
    return %c0_i32, %c0_i32_0 : i32, i32
  }
  func.func @transform_3(%arg0: i32) -> (i32, i32, i32) {
    %c0_i32 = arith.constant 0 : i32
    %c0_i32_0 = arith.constant 0 : i32
    %c0_i32_1 = arith.constant 0 : i32
    %c0_i32_2 = arith.constant 0 : i32
    return %c0_i32, %c0_i32_0, %c0_i32_1 : i32, i32, i32
  }
  func.func @transform_4(%arg0: i32) -> (i32, i32) {
    %c0_i32 = arith.constant 0 : i32
    %c0_i32_0 = arith.constant 0 : i32
    %c0_i32_1 = arith.constant 0 : i32
    return %c0_i32, %c0_i32_0 : i32, i32
  }
  func.func @transform_5(%arg0: i32) -> (i32, i32, i32) {
    %c0_i32 = arith.constant 0 : i32
    %c0_i32_0 = arith.constant 0 : i32
    %c0_i32_1 = arith.constant 0 : i32
    %c0_i32_2 = arith.constant 0 : i32
    return %c0_i32, %c0_i32_0, %c0_i32_1 : i32, i32, i32
  }
  func.func @transform_6(%arg0: i32) -> (i32, i32) {
    %c0_i32 = arith.constant 0 : i32
    %c0_i32_0 = arith.constant 0 : i32
    %c0_i32_1 = arith.constant 0 : i32
    return %c0_i32, %c0_i32_0 : i32, i32
  }
  func.func @transform_7(%arg0: i32) -> (i32, i32) {
    %c0_i32 = arith.constant 0 : i32
    %c0_i32_0 = arith.constant 0 : i32
    %c0_i32_1 = arith.constant 0 : i32
    return %c0_i32, %c0_i32_0 : i32, i32
  }
  func.func @transform_8(%arg0: i32) -> (i32, i32) {
    %c0_i32 = arith.constant 0 : i32
    %c0_i32_0 = arith.constant 0 : i32
    %c0_i32_1 = arith.constant 0 : i32
    return %c0_i32, %c0_i32_0 : i32, i32
  }
  func.func @transform_9(%arg0: i32) -> (i32, i32) {
    %c0_i32 = arith.constant 0 : i32
    %c0_i32_0 = arith.constant 0 : i32
    %c0_i32_1 = arith.constant 0 : i32
    return %c0_i32, %c0_i32_0 : i32, i32
  }
  func.func @transform_10(%arg0: i32) -> (i32, i32) {
    %c0_i32 = arith.constant 0 : i32
    %c0_i32_0 = arith.constant 0 : i32
    %c0_i32_1 = arith.constant 0 : i32
    return %c0_i32, %c0_i32_0 : i32, i32
  }
  func.func @transform_11(%arg0: i32) -> (i32, i32, i32) {
    %c0_i32 = arith.constant 0 : i32
    %c0_i32_0 = arith.constant 0 : i32
    %c0_i32_1 = arith.constant 0 : i32
    return %arg0, %c0_i32, %c0_i32_0 : i32, i32, i32
  }
}

</mosaic_0001>

<bundles_post_ra>
// kernel: bnn_forward.1
= control target key start
LH: loop header
LB: loop body
LE: loop exit
PB: predicated region body
PF: predicated region fallthrough
CT: control target
= control target key end

     0   :  { %16 = vsyncpa [#allocation3], 0  ;;  %s5564_s0 = inlined_call_operand.vmem [shape: f32[2,36,36], index: 0, kind: input, shape index: {}]   ;;  %s5565_s1 = inlined_call_operand.vmem [shape: bf16[128,36], index: 1, kind: input, shape index: {}]   ;;  %s5566_s2 = inlined_call_operand.vmem [shape: f32[32,1], index: 2, kind: input, shape index: {}]   ;;  %s5567_s3 = inlined_call_operand.vmem [shape: bf16[9,16,8], index: 3, kind: input, shape index: {}]   ;;  %s5568_s4 = inlined_call_operand.vmem [shape: f32[16,1], index: 4, kind: input, shape index: {}]   ;;  %s5569_s5 = inlined_call_operand.vmem [shape: bf16[16,29,120], index: 5, kind: input, shape index: {}]   ;;  %s5570_s6 = inlined_call_operand.vmem [shape: f32[1,120], index: 6, kind: input, shape index: {}]   ;;  %s5571_s7 = inlined_call_operand.vmem [shape: bf16[120,84], index: 7, kind: input, shape index: {}]   ;;  %s5572_s8 = inlined_call_operand.vmem [shape: f32[1,84], index: 8, kind: input, shape index: {}]   ;;  %s5573_s9 = inlined_call_operand.vmem [shape: bf16[84,10], index: 9, kind: input, shape index: {}]   ;;  %s5574_s10 = inlined_call_operand.vmem [shape: f32[1,10], index: 10, kind: input, shape index: {}]   ;;  %s5575_s11 = inlined_call_operand.hbm [shape: f32[2,1,10], index: 11, kind: output, shape index: {}]  }
   0x1   :  { %18 = vsyncpa [#allocation3 + $0x1], 0  ;;  %s4850_s17 = smov 0   ;;  %s4852_s18 = smov 0  }
   0x2   :  { %s4854_s19 = smov 0   ;;  %s4856_s20 = smov 0  }
   0x3 LB: > { %s4871_s21 = sadd.s32 4294967295, %s4780_s20   ;;  %s3660_s22 = sadd.s32 4294967294, %s4780_s20   ;;  %s4780_s20 = sphi %s4856_s20, %s5581_s20   ;;  %s4776_s19 = sphi %s4854_s19, %s5580_s19   ;;  %s4772_s18 = sphi %s4852_s18, %s5579_s18   ;;  %s4768_s17 = sphi %s4850_s17, %s5578_s17  }
   0x4   : > { %s4875_s23 = sadd.s32 1, %s4780_s20   ;;  %s267_s24 = sadd.s32 1, %s4776_s19 }
   0x5   : > { %s264_s25 = ssub.s32 %s4780_s20, %s4875_s23  ;;  %p277_p0 = scmp.ne.s32.totalorder %s4776_s19, %s4772_s18 }
   0x6   : > { %p265_p1 = scmp.eq.s32.totalorder %s264_s25, 0  ;;  %p278_p2 = scmp.eq.s32.totalorder %s4871_s21, 1 }
   0x7   : > { %p283_p3 = scmp.ne.s32.totalorder %s4772_s18, %s4768_s17  ;;  %p284_p4 = scmp.eq.s32.totalorder %s3660_s22, 1 }
   0x8   : > { %s4886_s26 = scalar_select %p265_p1, %s4776_s19, %s267_s24  }
   0x9   : > { %p4888_p5 = por %p278_p2, %p277_p0  ;;  %p4892_p6 = por %p284_p4, %p283_p3 }
   0xa   : > { %p3663_p7 = scmp.ge.s32.totalorder %s4780_s20, 1  ;;  %p340_p8 = scmp.lt.s32.totalorder %s4780_s20, 3 }
   0xc   : > { %p341_p9 = pnand %p3663_p7, %p340_p8 }
   0xd   : > { %p379_p10 = scmp.lt.s32.totalorder (!%p341_p9), %s4871_s21, 1  ;;  %v4655_v0 = vld [vmem:[%s5565_s1] sm:$0xff] (!%p341_p9)   ;;  %vm449_vm0 = vcmask (!%p341_p9), 293888   ;;  %v4782_v1 = vmov (!%p341_p9), 0   ;;  %vm474_vm1 = vcmask (!%p341_p9), 1041408   ;;  %v589_v11 = vld [vmem:[%s5566_s2 + $0x10] sm:$0xff] (!%p341_p9) }
   0xe   : > { %344 = sbr.rel (%p341_p9) target bundleno = 1671 (0x687), region = 64  ;;  %4022 = vmatprep.mubr.msk.bf16.mxu0 (!%p341_p9), %vm449_vm0, %v4655_v0  ;;  %4653 = vset.pattern.permute.xlu0 (!%p341_p9), %v4782_v1  ;;  %v587_v10 = vld [vmem:[%s5566_s2] sm:$0xff] (!%p341_p9)  ;;  %v588_v12 = vld [vmem:[%s5566_s2 + $0x8] sm:$0xff] (!%p341_p9)  ;;  %v590_v14 = vld [vmem:[%s5566_s2 + $0x18] sm:$0xff] (!%p341_p9)  ;;  %v4783_v22 = vmov (!%p341_p9), 0.0   ;;  %vm4784_vm2 = vmmov (!%p341_p9), 0  }
   0xf   : > { %4654 = vset.pattern.permute.xlu1 (!%p341_p9), %v4782_v1  ;;  %593 = vperm.xlu0 (!%p341_p9), %4653, %v587_v10   ;;  %v4656_v15 = vld [vmem:[%s5565_s1 + $0x8] sm:$0xff] (!%p341_p9)   ;;  %v4657_v16 = vld [vmem:[%s5565_s1 + $0x10] sm:$0xff] (!%p341_p9)   ;;  %v4658_v17 = vld [vmem:[%s5565_s1 + $0x18] sm:$0xff] (!%p341_p9)   ;;  %s4785_s25 = smov (!%p341_p9), 127   ;;  %vm656_vm3 = vcmask (!%p341_p9), 1043456   ;;  %vm652_vm4 = vcmask (!%p341_p9), 64512  }
  0x10   : > { %603 = vperm.xlu1 (!%p341_p9), %4654, %v589_v11   ;;  %v4659_v18 = vld [vmem:[%s5565_s1 + $0x20] sm:$0xff] (!%p341_p9)   ;;  %v4660_v19 = vld [vmem:[%s5565_s1 + $0x28] sm:$0xff] (!%p341_p9)   ;;  %v4661_v20 = vld [vmem:[%s5565_s1 + $0x30] sm:$0xff] (!%p341_p9)   ;;  %4050 = vmatprep.subr.bf16.mxu1 (!%p341_p9), %v4783_v22  ;;  %vm2374_vm5 = vcmask (!%p341_p9), 1045504   ;;  %vm2375_vm6 = vcmask (!%p341_p9), 1046528   ;;  %vm2370_vm7 = vcmask (!%p341_p9), 236544  }
  0x11   : > { %v4662_v21 = vld [vmem:[%s5565_s1 + $0x38] sm:$0xff] (!%p341_p9)   ;;  %4052 = vmatprep.mubr.msk.bf16.mxu1 (!%p341_p9), %vm4784_vm2, %v4783_v22  ;;  %v4987_v11 = vld [vmem:[%s5567_s3 + $0x10] sm:$0xff] (!%p341_p9)   ;;  %vm3449_vm8 = vcmask (!%p341_p9), 982016   ;;  %vm3543_vm9 = vcmask (!%p341_p9), 687104   ;;  %s377_s29 = sand.u32 (!%p341_p9), 1, %s4772_s18   ;;  %vm3590_vm10 = vcmask (!%p341_p9), 73728  }
  0x12   : > { %s378_s14 = scalar_lea.vmem (!%p341_p9), [#allocation2], %s377_s29  ;;  %s4789_s30 = smov (!%p341_p9), [#allocation2]  }
  0x13   : > { %598 = vperm.xlu0 (!%p341_p9), %4653, %v588_v12   ;;  %s3605_s15 = sshll.u32 (!%p341_p9), %s378_s14, 4  ;;  %s5524_s15 = int_to_ptr.vmem [resolvable:$true] %s3605_s15 }
  0x14   : > { %608 = vperm.xlu1 (!%p341_p9), %4654, %v590_v14  }
  0x15   : > { %s380_s12 = scalar_select %p379_p10, %s4871_s21, 1 }
  0x17   : > { %s4606_s13 = smul.u32 40, %s380_s12  ;;  %s4786_s12 = smov 122  }
  0x19   : > { %s383_s16 = scalar_lea.vmem %s5564_s0, %s4606_s13  ;;  %s4787_s13 = smov 121  }
  0x1a   : > { %v385_v2 = vld [vmem:[%s383_s16] sm:$0xff]  ;;  %v386_v3 = vld [vmem:[%s383_s16 + $0x8] sm:$0xff]  ;;  %v387_v4 = vld [vmem:[%s383_s16 + $0x10] sm:$0xff] }
  0x1b   : > { %v390_v5 = vpack.c.bf16 %v386_v3, %v385_v2  ;;  %v388_v6 = vld [vmem:[%s383_s16 + $0x18] sm:$0xff]  ;;  %v389_v7 = vld [vmem:[%s383_s16 + $0x20] sm:$0xf]  ;;  %v4959_v3 = vld [vmem:[%s5567_s3 + $0x8] sm:$0xff]  }
  0x1c   : > { %v391_v8 = vpack.c.bf16 %v388_v6, %v387_v4  ;;  %v392_v9 = vpack.c.bf16 %v389_v7, %v389_v7  ;;  %v4971_v6 = vld [vmem:[%s5567_s3] sm:$0xff]  }
  0x1d   : > { %4016 = vmatprep.subr.bf16.mxu0 %v390_v5  ;;  %v2337_v7 = vld [vmem:[%s5568_s4] sm:$0xff] }
  0x1e   : > { %4017 = vmatpush3.bf16.msra.mxu0 %v390_v5  ;;  %v476_v13 = vsel %vm474_vm1, %v392_v9, 0 }
  0x1f   : > { %4018 = vmatprep.subr.bf16.mxu0 %v391_v8 }
  0x22   : > { %4019 = vmatpush3.bf16.msra.mxu0 %v391_v8  ;;  %v2338_v8 = vld [vmem:[%s5568_s4 + $0x8] sm:$0xff] }
  0x23   : > { %4605 = vmatprep.subr.msk.bf16.mxu0 %vm474_vm1, %v392_v9 }
  0x26   : > { %4021 = vmatpush3.bf16.msra.mxu0 %v476_v13  ;;  %v5008_v13 = vld [vmem:[%s5567_s3 + $0x18] sm:$0xff]  }
  0x27   : > { %4038 = vmatprep.subr.bf16.mxu0 %v4783_v22 }
  0x29   : > { %4023 = vmatmul.mubr.msk.bf16.vlgmr.msra.gmra.mrb[0].mxu0 %vm449_vm0, %v4656_v15 }
  0x2a   : > { %4026 = vmatprep.mubr.msk.bf16.mxu0 %vm449_vm0, %v4657_v16 }
  0x31   : > { %4027 = vmatmul.mubr.msk.bf16.gmra.mrb[4].mxu0 %vm449_vm0, %v4658_v17  ;;  %v5028_v17 = vld [vmem:[%s5567_s3 + $0x20] sm:$0xff]  }
  0x32   : > { %4030 = vmatprep.mubr.msk.bf16.mxu0 %vm449_vm0, %v4659_v18 }
  0x39   : > { %4031 = vmatmul.mubr.msk.bf16.gmra.mrb[8].mxu0 %vm449_vm0, %v4660_v19 }
  0x3a   : > { %4034 = vmatprep.mubr.msk.bf16.mxu0 %vm449_vm0, %v4661_v20  ;;  %v5048_v20 = vld [vmem:[%s5567_s3 + $0x28] sm:$0xff]  }
  0x41   : > { %4035 = vmatmul.mubr.msk.bf16.gmra.mrb[12].mxu0 %vm449_vm0, %v4662_v21 }
  0x42   : > { %4040 = vmatprep.mubr.msk.bf16.mxu0 %vm4784_vm2, %v4783_v22 }
  0x8e   : > { %v594_v42 = vpop.permute.xlu0 %593 }
  0x8f   : > { %v604_v39 = vpop.permute.xlu1 %603 }
  0x92   : > { %v599_v56 = vpop.permute.xlu0 %598 }
  0x93   : > { %v609_v51 = vpop.permute.xlu1 %608 }
  0xfc   : > { %v4024_v23 = vpop.f32.mrb[0].mxu0 }
  0xfd   : > { %v512_v24 = vpop.f32.mrb[1].mxu0 }
  0xfe   : > { %v4025_v25 = vpop.f32.mrb[2].mxu0 }
  0xff   : > { %v515_v26 = vpop.f32.mrb[3].mxu0 }
 0x104   : > { %v4028_v27 = vpop.f32.mrb[4].mxu0 }
 0x105   : > { %v577_v28 = vmax.f32 %v4024_v23, %v4028_v27  ;;  %v528_v29 = vpop.f32.mrb[5].mxu0 }
 0x106   : > { %v575_v30 = vmax.f32 %v512_v24, %v528_v29  ;;  %v4029_v31 = vpop.f32.mrb[6].mxu0  ;;  %v5085_v29 = vld [vmem:[%s5567_s3 + $0x38] sm:$0xff]  }
 0x107   : > { %v578_v32 = vmax.f32 %v4025_v25, %v4029_v31  ;;  %v531_v33 = vpop.f32.mrb[7].mxu0  ;;  %v5065_v25 = vld [vmem:[%s5567_s3 + $0x30] sm:$0xff]  }
 0x108   : > { %v576_v34 = vmax.f32 %v515_v26, %v531_v33 }
 0x10c   : > { %v4032_v35 = vpop.f32.mrb[8].mxu0 }
 0x10d   : > { %v544_v36 = vpop.f32.mrb[9].mxu0 }
 0x10e   : > { %v4033_v37 = vpop.f32.mrb[10].mxu0 }
 0x10f   : > { %v547_v38 = vpop.f32.mrb[11].mxu0 }
 0x114   : > { %v4036_v40 = vpop.f32.mrb[12].mxu0 }
 0x115   : > { %v581_v41 = vmax.f32 %v4032_v35, %v4036_v40  ;;  %v560_v43 = vpop.f32.mrb[13].mxu0 }
 0x116   : > { %v579_v44 = vmax.f32 %v544_v36, %v560_v43  ;;  %v4037_v45 = vpop.f32.mrb[14].mxu0 }
 0x117   : > { %v585_v46 = vmax.f32 %v577_v28, %v581_v41  ;;  %v582_v47 = vmax.f32 %v4033_v37, %v4037_v45  ;;  %v563_v48 = vpop.f32.mrb[15].mxu0 }
 0x118   : > { %v583_v49 = vmax.f32 %v575_v30, %v579_v44  ;;  %v580_v50 = vmax.f32 %v547_v38, %v563_v48 }
 0x119   : > { %v586_v52 = vmax.f32 %v578_v32, %v582_v47  ;;  %v613_v54 = vadd.f32 %v604_v39, %v585_v46  ;;  %v5105_v32 = vld [vmem:[%s5567_s3 + $0x40] sm:$0xff]  }
 0x11a   : > { %v611_v53 = vadd.f32 %v594_v42, %v583_v49  ;;  %v584_v55 = vmax.f32 %v576_v34, %v580_v50  ;;  %v4672_v50 = vld [vmem:[%s5569_s5] sm:$0xff]  }
 0x11b   : > { %v614_v59 = vadd.f32 %v609_v51, %v586_v52  ;;  %v617_v61 = vmax.f32 %v613_v54, 0.0  ;;  %v4673_v54 = vld [vmem:[%s5569_s5 + $0x8] sm:$0x7f]  }
 0x11c   : > { %v615_v57 = vmax.f32 %v611_v53, 0.0  ;;  %v612_v58 = vadd.f32 %v599_v56, %v584_v55  ;;  %v4788_v55 = vmov 65535  }
 0x11d   : > { %v618_v0 = vmax.f32 %v614_v59, 0.0  ;;  %v810_v1 = vpack.c.bf16 %v617_v61, %v617_v61  ;;  %v2376_v56 = vsel %vm2374_vm5, 4294967295, %v4788_v55 }
 0x11e   : > { %v645_v60 = vpack.c.bf16 %v615_v57, %v615_v57  ;;  %v616_v62 = vmax.f32 %v612_v58, 0.0  ;;  %v5243_v57 = vsel %vm2375_vm6, %v2376_v56, 0 }
 0x11f   : > { %v865_v4 = vpack.c.bf16 %v618_v0, %v618_v0  ;;  %v4996_v12 = vsel %vm656_vm3, %v810_v1, 0  ;;  %v2379_v58 = vand.u32 %v4673_v54, %v5243_v57 }
 0x120   : > { %v646_v63 = vpack.c.bf16 %v616_v62, %v616_v62  ;;  %759 = vrot.lane.b32.xlu0 %v645_v60, %s4785_s25  ;;  %v710_v5 = vsel %vm656_vm3, %v645_v60, 0 }
 0x121   : > { %v5014_v16 = vsel %vm656_vm3, %v865_v4, 0 }
 0x122   : > { %1228 = vrot.lane.b32.xlu1 %v646_v63, %s4785_s25  ;;  %v658_v2 = vsel %vm656_vm3, %v646_v63, 0 }
 0x123   : > { %4039 = vmatpush3.bf16.msra.mxu0 %v658_v2 }
 0x124   : > { %926 = vrot.lane.b32.xlu0 %v810_v1, %s4785_s25  ;;  %4044 = vmatprep.subr.bf16.mxu0 %v4783_v22 }
 0x126   : > { %1363 = vrot.lane.b32.xlu1 %v865_v4, %s4785_s25  ;;  %4041 = vmatmul.mubr.msk.bf16.vlgmr.msra.gmra.mrb[16].mxu0 %vm652_vm4, %v4959_v3  ;;  %s4718_s25 = scalar_lea.vmem %s5524_s15, 16 }
 0x127   : > { %4045 = vmatpush3.bf16.msra.mxu0 %v710_v5  ;;  %4046 = vmatprep.mubr.msk.bf16.mxu0 %vm4784_vm2, %v4783_v22  ;;  %p4719_p11 = scmp.ne.s32.totalorder %s5524_s15, %s4718_s25 }
 0x128   : > { %982 = vrot.lane.b32.xlu0 %v645_v60, %s4786_s12  ;;  %4092 = vmatprep.subr.bf16.mxu0 %v4783_v22 }
 0x129   : > { %p4720_p12 = pnand %p4719_p11, %p4888_p5 }
 0x12a   : > { %1039 = vrot.lane.b32.xlu1 %v646_v63, %s4786_s12 }
 0x12b   : > { %p4721_p13 = pneg %p4720_p12 }
 0x12c   : > { %1095 = vrot.lane.b32.xlu0 %v645_v60, %s4787_s13 }
 0x12e   : > { %1497 = vrot.lane.b32.xlu1 %v646_v63, %s4787_s13 }
 0x130   : > { %1801 = vrot.lane.b32.xlu0 %v810_v1, %s4786_s12 }
 0x132   : > { %1849 = vrot.lane.b32.xlu1 %v865_v4, %s4786_s12  ;;  %4047 = vmatmul.mubr.msk.bf16.vlgmr.msra.gmra.mrb[16].mxu0 %vm652_vm4, %v4971_v6  ;;  %s4722_s12 = sshll.u32 %s4789_s30, 4  ;;  %s4723_s12 = int_to_ptr.vmem [resolvable:$false] %s4722_s12 }
 0x133   : > { %4094 = vmatprep.mubr.msk.bf16.mxu0 %vm4784_vm2, %v4783_v22  ;;  %s4724_s16 = scalar_lea.vmem %s4723_s12, 32  ;;  %p4725_p0 = scmp.lt.s32.totalorder %s5524_s15, %s4723_s12 }
 0x134   : > { %1897 = vrot.lane.b32.xlu0 %v810_v1, %s4787_s13  ;;  %p4726_p1 = scmp.lt.s32.totalorder %s4724_s16, %s4718_s25 }
 0x136   : > { %2287 = vrot.lane.b32.xlu1 %v865_v4, %s4787_s13  ;;  %s3866_s13 = sshll.u32 %s4871_s21, 4  ;;  %s3593_s21 = scalar_lea.sflag [#allocation3], %s377_s29 }
 0x137   : > { %s5522_s24 = scalar_lea.hbm %s5575_s11, %s3866_s13  ;;  %p4727_p2 = por %p4726_p1, %p4725_p0 }
 0x138   : > { %2341 = vperm.xlu0 %4653, %v2337_v7  }
 0x139   : > { %p4728_p3 = pnand %p4727_p2, %p4721_p13 }
 0x13a   : > { %2346 = vperm.xlu1 %4654, %v2338_v8  }
 0x192   : > { %v760_v9 = vpop.permute.xlu0 %759 }
 0x193   : > { %v765_v10 = vsel %vm656_vm3, %v760_v9, 0 }
 0x194   : > { %4051 = vmatpush3.bf16.msra.mxu1 %v765_v10  ;;  %4093 = vmatpush3.bf16.msra.mxu0 %v765_v10  ;;  %v1229_v14 = vpop.permute.xlu1 %1228 }
 0x195   : > { %4056 = vmatprep.subr.bf16.mxu1 %v4783_v22  ;;  %4098 = vmatprep.subr.bf16.mxu0 %v4783_v22  ;;  %v1231_v15 = vsel %vm656_vm3, %v1229_v14, 0 }
 0x196   : > { %v927_v18 = vpop.permute.xlu0 %926 }
 0x197   : > { %4053 = vmatmul.mubr.msk.bf16.vlgmr.msra.gmra.mrb[0].mxu1 %vm652_vm4, %v4987_v11  ;;  %4095 = vmatmul.mubr.msk.bf16.vlgmr.msra.gmra.mrb[20].mxu0 %vm652_vm4, %v4959_v3  ;;  %v5031_v19 = vsel %vm656_vm3, %v927_v18, 0 }
 0x198   : > { %4057 = vmatpush3.bf16.msra.mxu1 %v4996_v12  ;;  %4099 = vmatpush3.bf16.msra.mxu0 %v658_v2  ;;  %v1364_v24 = vpop.permute.xlu1 %1363 }
 0x199   : > { %4058 = vmatprep.mubr.msk.bf16.mxu1 %vm4784_vm2, %v4783_v22  ;;  %4062 = vmatprep.subr.bf16.mxu1 %v4783_v22  ;;  %v1366_v27 = vsel %vm656_vm3, %v1364_v24, 0 }
 0x19a   : > { %4100 = vmatprep.mubr.msk.bf16.mxu0 %vm4784_vm2, %v4783_v22  ;;  %4104 = vmatprep.subr.bf16.mxu0 %v4783_v22  ;;  %v983_v21 = vpop.permute.xlu0 %982 }
 0x19b   : > { %v988_v23 = vsel %vm656_vm3, %v983_v21, 0  ;;  %v4677_v21 = vld [vmem:[%s5569_s5 + $0x28] sm:$0x7f]  }
 0x19c   : > { %v1040_v26 = vpop.permute.xlu1 %1039  ;;  %v2509_v24 = vand.u32 %v4677_v21, %v5243_v57 }
 0x19d   : > { %v5069_v28 = vsel %vm656_vm3, %v1040_v26, 0  ;;  %v4679_v26 = vld [vmem:[%s5569_s5 + $0x38] sm:$0x7f]  }
 0x19e   : > { %v1096_v30 = vpop.permute.xlu0 %1095 }
 0x19f   : > { %v5088_v31 = vsel %vm656_vm3, %v1096_v30, 0  ;;  %v4681_v30 = vld [vmem:[%s5569_s5 + $0x48] sm:$0x7f]  }
 0x1a0   : > { %v1498_v33 = vpop.permute.xlu1 %1497 }
 0x1a1   : > { %v1500_v34 = vsel %vm656_vm3, %v1498_v33, 0  ;;  %v4682_v33 = vld [vmem:[%s5569_s5 + $0x50] sm:$0xff]  }
 0x1a2   : > { %v1802_v39 = vpop.permute.xlu0 %1801 }
 0x1a3   : > { %4059 = vmatmul.mubr.msk.bf16.vlgmr.msra.gmra.mrb[0].mxu1 %vm652_vm4, %v5008_v13  ;;  %4101 = vmatmul.mubr.msk.bf16.vlgmr.msra.gmra.mrb[20].mxu0 %vm652_vm4, %v4971_v6  ;;  %v1804_v40 = vsel %vm656_vm3, %v1802_v39, 0  ;;  %v4684_v39 = vld [vmem:[%s5569_s5 + $0x60] sm:$0xff]  }
 0x1a4   : > { %4063 = vmatpush3.bf16.msra.mxu1 %v5014_v16  ;;  %4105 = vmatpush3.bf16.msra.mxu0 %v1231_v15  ;;  %v1850_v41 = vpop.permute.xlu1 %1849 }
 0x1a5   : > { %4064 = vmatprep.mubr.msk.bf16.mxu1 %vm4784_vm2, %v4783_v22  ;;  %4068 = vmatprep.subr.bf16.mxu1 %v4783_v22  ;;  %v1852_v42 = vsel %vm656_vm3, %v1850_v41, 0 }
 0x1a6   : > { %4106 = vmatprep.mubr.msk.bf16.mxu0 %vm4784_vm2, %v4783_v22  ;;  %4110 = vmatprep.subr.bf16.mxu0 %v4783_v22  ;;  %v1898_v43 = vpop.permute.xlu0 %1897 }
 0x1a7   : > { %v1900_v44 = vsel %vm656_vm3, %v1898_v43, 0 }
 0x1a8   : > { %v2288_v45 = vpop.permute.xlu1 %2287 }
 0x1a9   : > { %v2290_v46 = vsel %vm656_vm3, %v2288_v45, 0  ;;  %v4708_v45 = vld [vmem:[%s5571_s7 + $0x20] sm:$0xff]  }
 0x1af   : > { %4065 = vmatmul.mubr.msk.bf16.vlgmr.msra.gmra.mrb[0].mxu1 %vm652_vm4, %v5028_v17  ;;  %4107 = vmatmul.mubr.msk.bf16.vlgmr.msra.gmra.mrb[20].mxu0 %vm652_vm4, %v4987_v11 }
 0x1b0   : > { %4069 = vmatpush3.bf16.msra.mxu1 %v5031_v19  ;;  %4111 = vmatpush3.bf16.msra.mxu0 %v5014_v16 }
 0x1b1   : > { %4070 = vmatprep.mubr.msk.bf16.mxu1 %vm4784_vm2, %v4783_v22  ;;  %4074 = vmatprep.subr.bf16.mxu1 %v4783_v22 }
 0x1b2   : > { %4112 = vmatprep.mubr.msk.bf16.mxu0 %vm4784_vm2, %v4783_v22  ;;  %4116 = vmatprep.subr.bf16.mxu0 %v4783_v22 }
 0x1b7   : > { %v2342_v10 = vpop.permute.xlu0 %2341 }
 0x1b9   : > { %v2347_v54 = vpop.permute.xlu1 %2346 }
 0x1bb   : > { %4071 = vmatmul.mubr.msk.bf16.vlgmr.msra.gmra.mrb[0].mxu1 %vm652_vm4, %v5048_v20  ;;  %4113 = vmatmul.mubr.msk.bf16.vlgmr.msra.gmra.mrb[20].mxu0 %vm652_vm4, %v5008_v13 }
 0x1bc   : > { %4075 = vmatpush3.bf16.msra.mxu1 %v988_v23  ;;  %4117 = vmatpush3.bf16.msra.mxu0 %v5031_v19 }
 0x1bd   : > { %4076 = vmatprep.mubr.msk.bf16.mxu1 %vm4784_vm2, %v4783_v22  ;;  %4080 = vmatprep.subr.bf16.mxu1 %v4783_v22 }
 0x1be   : > { %4118 = vmatprep.mubr.msk.bf16.mxu0 %vm4784_vm2, %v4783_v22  ;;  %4122 = vmatprep.subr.bf16.mxu0 %v4783_v22 }
 0x1c7   : > { %4077 = vmatmul.mubr.msk.bf16.vlgmr.msra.gmra.mrb[0].mxu1 %vm652_vm4, %v5065_v25  ;;  %4119 = vmatmul.mubr.msk.bf16.vlgmr.msra.gmra.mrb[20].mxu0 %vm652_vm4, %v5028_v17 }
 0x1c8   : > { %4081 = vmatpush3.bf16.msra.mxu1 %v5069_v28  ;;  %4123 = vmatpush3.bf16.msra.mxu0 %v1366_v27 }
 0x1c9   : > { %4082 = vmatprep.mubr.msk.bf16.mxu1 %vm4784_vm2, %v4783_v22  ;;  %4086 = vmatprep.subr.bf16.mxu1 %v4783_v22 }
 0x1ca   : > { %4124 = vmatprep.mubr.msk.bf16.mxu0 %vm4784_vm2, %v4783_v22  ;;  %4128 = vmatprep.subr.bf16.mxu0 %v4783_v22 }
 0x1d3   : > { %4083 = vmatmul.mubr.msk.bf16.vlgmr.msra.gmra.mrb[0].mxu1 %vm652_vm4, %v5085_v29  ;;  %4125 = vmatmul.mubr.msk.bf16.vlgmr.msra.gmra.mrb[20].mxu0 %vm652_vm4, %v5048_v20 }
 0x1d4   : > { %4087 = vmatpush3.bf16.msra.mxu1 %v5088_v31  ;;  %4129 = vmatpush3.bf16.msra.mxu0 %v5069_v28 }
 0x1d5   : > { %4088 = vmatprep.mubr.msk.bf16.mxu1 %vm4784_vm2, %v4783_v22  ;;  %4130 = vmatprep.mubr.msk.bf16.mxu0 %vm4784_vm2, %v4783_v22 }
 0x1d6   : > { %4134 = vmatprep.subr.bf16.mxu0 %v4783_v22  ;;  %4146 = vmatprep.subr.bf16.mxu1 %v4783_v22 }
 0x1df   : > { %4089 = vmatmul.mubr.msk.bf16.vlgmr.msra.gmra.mrb[0].mxu1 %vm652_vm4, %v5105_v32  ;;  %4131 = vmatmul.mubr.msk.bf16.vlgmr.msra.gmra.mrb[20].mxu0 %vm652_vm4, %v5065_v25 }
 0x1e0   : > { %4135 = vmatpush3.bf16.msra.mxu0 %v5088_v31  ;;  %4147 = vmatpush3.bf16.msra.mxu1 %v5014_v16 }
 0x1e1   : > { %4148 = vmatprep.mubr.msk.bf16.mxu1 %vm4784_vm2, %v4783_v22  ;;  %4152 = vmatprep.subr.bf16.mxu1 %v4783_v22 }
 0x1e2   : > { %4136 = vmatprep.mubr.msk.bf16.mxu0 %vm4784_vm2, %v4783_v22  ;;  %4140 = vmatprep.subr.bf16.mxu0 %v4783_v22 }
 0x1e7   : > { %4149 = vmatmul.mubr.msk.bf16.vlgmr.msra.gmra.mrb[4].mxu1 %vm652_vm4, %v4959_v3 }
 0x1e8   : > { %4153 = vmatpush3.bf16.msra.mxu1 %v4996_v12  ;;  %4154 = vmatprep.mubr.msk.bf16.mxu1 %vm4784_vm2, %v4783_v22 }
 0x1e9   : > { %4158 = vmatprep.subr.bf16.mxu1 %v4783_v22 }
 0x1eb   : > { %4137 = vmatmul.mubr.msk.bf16.vlgmr.msra.gmra.mrb[20].mxu0 %vm652_vm4, %v5085_v29 }
 0x1ec   : > { %4141 = vmatpush3.bf16.msra.mxu0 %v1500_v34  ;;  %4142 = vmatprep.mubr.msk.bf16.mxu0 %vm4784_vm2, %v4783_v22 }
 0x1ed   : > { %4200 = vmatprep.subr.bf16.mxu0 %v4783_v22 }
 0x1f3   : > { %4155 = vmatmul.mubr.msk.bf16.vlgmr.msra.gmra.mrb[4].mxu1 %vm652_vm4, %v4971_v6 }
 0x1f4   : > { %4159 = vmatpush3.bf16.msra.mxu1 %v5031_v19  ;;  %4160 = vmatprep.mubr.msk.bf16.mxu1 %vm4784_vm2, %v4783_v22 }
 0x1f5   : > { %4164 = vmatprep.subr.bf16.mxu1 %v4783_v22 }
 0x1f7   : > { %4143 = vmatmul.mubr.msk.bf16.vlgmr.msra.gmra.mrb[20].mxu0 %vm652_vm4, %v5105_v32 }
 0x1f8   : > { %4201 = vmatpush3.bf16.msra.mxu0 %v5031_v19  ;;  %4202 = vmatprep.mubr.msk.bf16.mxu0 %vm4784_vm2, %v4783_v22 }
 0x1f9   : > { %4206 = vmatprep.subr.bf16.mxu0 %v4783_v22 }
 0x1ff   : > { %4161 = vmatmul.mubr.msk.bf16.vlgmr.msra.gmra.mrb[4].mxu1 %vm652_vm4, %v4987_v11  ;;  %4203 = vmatmul.mubr.msk.bf16.vlgmr.msra.gmra.mrb[24].mxu0 %vm652_vm4, %v4959_v3 }
 0x200   : > { %4165 = vmatpush3.bf16.msra.mxu1 %v988_v23  ;;  %4207 = vmatpush3.bf16.msra.mxu0 %v5014_v16  ;;  %v4674_v16 = vld [vmem:[%s5569_s5 + $0x10] sm:$0xff]  }
 0x201   : > { %4166 = vmatprep.mubr.msk.bf16.mxu1 %vm4784_vm2, %v4783_v22  ;;  %4170 = vmatprep.subr.bf16.mxu1 %v4783_v22 }
 0x202   : > { %4208 = vmatprep.mubr.msk.bf16.mxu0 %vm4784_vm2, %v4783_v22  ;;  %4212 = vmatprep.subr.bf16.mxu0 %v4783_v22 }
 0x205   : > { %v5154_v35 = vpop.f32.mrb[16].mxu0 }
 0x206   : > { %v4048_v36 = vpop.f32.mrb[17].mxu0 }
 0x207   : > { %v5156_v37 = vpop.f32.mrb[18].mxu0 }
 0x208   : > { %v4049_v38 = vpop.f32.mrb[19].mxu0 }
 0x209   : > { %v4705_v38 = vld [vmem:[%s5571_s7 + $0x8] sm:$0xff]  }
 0x20b   : > { %4167 = vmatmul.mubr.msk.bf16.vlgmr.msra.gmra.mrb[4].mxu1 %vm652_vm4, %v5008_v13  ;;  %4209 = vmatmul.mubr.msk.bf16.vlgmr.msra.gmra.mrb[24].mxu0 %vm652_vm4, %v4971_v6 }
 0x20c   : > { %4171 = vmatpush3.bf16.msra.mxu1 %v5069_v28  ;;  %4213 = vmatpush3.bf16.msra.mxu0 %v1366_v27 }
 0x20d   : > { %4172 = vmatprep.mubr.msk.bf16.mxu1 %vm4784_vm2, %v4783_v22  ;;  %4176 = vmatprep.subr.bf16.mxu1 %v4783_v22 }
 0x20e   : > { %4214 = vmatprep.mubr.msk.bf16.mxu0 %vm4784_vm2, %v4783_v22  ;;  %4218 = vmatprep.subr.bf16.mxu0 %v4783_v22 }
 0x217   : > { %4173 = vmatmul.mubr.msk.bf16.vlgmr.msra.gmra.mrb[4].mxu1 %vm652_vm4, %v5028_v17  ;;  %4215 = vmatmul.mubr.msk.bf16.vlgmr.msra.gmra.mrb[24].mxu0 %vm652_vm4, %v4987_v11 }
 0x218   : > { %4177 = vmatpush3.bf16.msra.mxu1 %v5088_v31  ;;  %4219 = vmatpush3.bf16.msra.mxu0 %v5069_v28  ;;  %v2573_v28 = vand.u32 %v4679_v26, %v5243_v57 }
 0x219   : > { %4178 = vmatprep.mubr.msk.bf16.mxu1 %vm4784_vm2, %v4783_v22  ;;  %4182 = vmatprep.subr.bf16.mxu1 %v4783_v22 }
 0x21a   : > { %4220 = vmatprep.mubr.msk.bf16.mxu0 %vm4784_vm2, %v4783_v22  ;;  %4224 = vmatprep.subr.bf16.mxu0 %v4783_v22 }
 0x223   : > { %4179 = vmatmul.mubr.msk.bf16.vlgmr.msra.gmra.mrb[4].mxu1 %vm652_vm4, %v5048_v20  ;;  %4221 = vmatmul.mubr.msk.bf16.vlgmr.msra.gmra.mrb[24].mxu0 %vm652_vm4, %v5008_v13 }
 0x224   : > { %4183 = vmatpush3.bf16.msra.mxu1 %v1804_v40  ;;  %4225 = vmatpush3.bf16.msra.mxu0 %v5088_v31  ;;  %v4685_v40 = vld [vmem:[%s5569_s5 + $0x68] sm:$0x7f]  }
 0x225   : > { %4184 = vmatprep.mubr.msk.bf16.mxu1 %vm4784_vm2, %v4783_v22  ;;  %4188 = vmatprep.subr.bf16.mxu1 %v4783_v22  ;;  %v2765_v43 = vand.u32 %v4685_v40, %v5243_v57  ;;  %v4717_v40 = vld [vmem:[%s5573_s9 + $0x28] ss:$0 sps:$4 sm:$0x33]  }
 0x226   : > { %4226 = vmatprep.mubr.msk.bf16.mxu0 %vm4784_vm2, %v4783_v22  ;;  %4230 = vmatprep.subr.bf16.mxu0 %v4783_v22 }
 0x22f   : > { %4185 = vmatmul.mubr.msk.bf16.vlgmr.msra.gmra.mrb[4].mxu1 %vm652_vm4, %v5065_v25  ;;  %4227 = vmatmul.mubr.msk.bf16.vlgmr.msra.gmra.mrb[24].mxu0 %vm652_vm4, %v5028_v17  ;;  %v4675_v17 = vld [vmem:[%s5569_s5 + $0x18] sm:$0x7f]  }
 0x230   : > { %4189 = vmatpush3.bf16.msra.mxu1 %v1852_v42  ;;  %4231 = vmatpush3.bf16.msra.mxu0 %v1500_v34  ;;  %v2444_v19 = vand.u32 %v4675_v17, %v5243_v57  ;;  %v4683_v34 = vld [vmem:[%s5569_s5 + $0x58] sm:$0x7f]  }
 0x231   : > { %4190 = vmatprep.mubr.msk.bf16.mxu1 %vm4784_vm2, %v4783_v22  ;;  %4194 = vmatprep.subr.bf16.mxu1 %v4783_v22  ;;  %v2701_v36 = vand.u32 %v4683_v34, %v5243_v57  ;;  %v4712_v34 = vld [vmem:[%s5573_s9] sm:$0xff]  }
 0x232   : > { %4232 = vmatprep.mubr.msk.bf16.mxu0 %vm4784_vm2, %v4783_v22  ;;  %4236 = vmatprep.subr.bf16.mxu0 %v4783_v22 }
 0x23b   : > { %4191 = vmatmul.mubr.msk.bf16.vlgmr.msra.gmra.mrb[4].mxu1 %vm652_vm4, %v5085_v29  ;;  %4233 = vmatmul.mubr.msk.bf16.vlgmr.msra.gmra.mrb[24].mxu0 %vm652_vm4, %v5048_v20  ;;  %v4676_v20 = vld [vmem:[%s5569_s5 + $0x20] sm:$0xff]  }
 0x23c   : > { %4195 = vmatpush3.bf16.msra.mxu1 %v1900_v44  ;;  %4237 = vmatpush3.bf16.msra.mxu0 %v1852_v42  ;;  %v4706_v42 = vld [vmem:[%s5571_s7 + $0x10] sm:$0xff]  }
 0x23d   : > { %4196 = vmatprep.mubr.msk.bf16.mxu1 %vm4784_vm2, %v4783_v22  ;;  %4238 = vmatprep.mubr.msk.bf16.mxu0 %vm4784_vm2, %v4783_v22 }
 0x23e   : > { %4242 = vmatprep.subr.bf16.mxu0 %v4783_v22  ;;  %4254 = vmatprep.subr.bf16.mxu1 %v4783_v22 }
 0x247   : > { %4197 = vmatmul.mubr.msk.bf16.vlgmr.msra.gmra.mrb[4].mxu1 %vm652_vm4, %v5105_v32  ;;  %4239 = vmatmul.mubr.msk.bf16.vlgmr.msra.gmra.mrb[24].mxu0 %vm652_vm4, %v5065_v25  ;;  %v4678_v25 = vld [vmem:[%s5569_s5 + $0x30] sm:$0xff]  }
 0x248   : > { %4243 = vmatpush3.bf16.msra.mxu0 %v1900_v44  ;;  %4244 = vmatprep.mubr.msk.bf16.mxu0 %vm4784_vm2, %v4783_v22  ;;  %v4707_v44 = vld [vmem:[%s5571_s7 + $0x18] sm:$0xff]  }
 0x249   : > { %4248 = vmatprep.subr.bf16.mxu0 %v4783_v22  ;;  %4258 = vmatprep.mubr.msk.bf16.mxu1 %vm4784_vm2, %v4783_v22 }
 0x24a   : > { %4255 = vmatpush3.bf16.msra.mxu1 %v4672_v50 }
 0x24b   : > { %4256 = vmatprep.subr.bf16.mxu1 %v4783_v22 }
 0x24e   : > { %4257 = vmatpush3.bf16.msra.mxu1 %v2379_v58 }
 0x24f   : > { %4262 = vmatprep.subr.bf16.mxu1 %v4783_v22 }
 0x253   : > { %4245 = vmatmul.mubr.msk.bf16.vlgmr.msra.gmra.mrb[24].mxu0 %vm652_vm4, %v5085_v29  ;;  %v4680_v29 = vld [vmem:[%s5569_s5 + $0x40] sm:$0xff]  }
 0x254   : > { %4249 = vmatpush3.bf16.msra.mxu0 %v2290_v46  ;;  %4250 = vmatprep.mubr.msk.bf16.mxu0 %vm4784_vm2, %v4783_v22  ;;  %v4686_v46 = vld [vmem:[%s5569_s5 + $0x70] sm:$0xff]  }
 0x255   : > { %4382 = vmatprep.subr.bf16.mxu0 %v4783_v22 }
 0x25f   : > { %4251 = vmatmul.mubr.msk.bf16.vlgmr.msra.gmra.mrb[24].mxu0 %vm652_vm4, %v5105_v32  ;;  %v2637_v32 = vand.u32 %v4681_v30, %v5243_v57 }
 0x260   : > { %4398 = vmatprep.mubr.msk.bf16.mxu0 %vm4784_vm2, %v4783_v22 }
 0x2b2   : > { %v1137_v47 = vpop.f32.mrb[0].mxu1 }
 0x2b3   : > { %v4418_v48 = vadd.f32 %v1137_v47, %v5154_v35  ;;  %v4090_v49 = vpop.f32.mrb[1].mxu1  ;;  %v4687_v47 = vld [vmem:[%s5569_s5 + $0x78] sm:$0x7f]  }
 0x2b4   : > { %v1140_v51 = vpop.f32.mrb[2].mxu1  ;;  %v4709_v49 = vld [vmem:[%s5571_s7 + $0x28] sm:$0xff]   ;;  %v2829_v50 = vand.u32 %v4687_v47, %v5243_v57 }
 0x2b5   : > { %v4419_v52 = vadd.f32 %v1140_v51, %v5156_v37  ;;  %v4091_v53 = vpop.f32.mrb[3].mxu1  ;;  %v4704_v37 = vld [vmem:[%s5571_s7] sm:$0xff]  }
 0x2b6   : > { %4383 = vmatpush3.bf16.msra.mxu0 %v4704_v37  ;;  %v4688_v51 = vld [vmem:[%s5569_s5 + $0x80] sm:$0xff]   ;;  %v4714_v37 = vld [vmem:[%s5573_s9 + $0x10] sm:$0xff]  }
 0x2b7   : > { %4384 = vmatprep.subr.bf16.mxu0 %v4783_v22 }
 0x2ba   : > { %4385 = vmatpush3.bf16.msra.mxu0 %v4705_v38  ;;  %v4715_v38 = vld [vmem:[%s5573_s9 + $0x18] sm:$0xff]  }
 0x2bb   : > { %4386 = vmatprep.subr.bf16.mxu0 %v4783_v22 }
 0x2be   : > { %4387 = vmatpush3.bf16.msra.mxu0 %v4706_v42  ;;  %v3403_v42 = vld [vmem:[%s5572_s8] sm:$0x1] }
 0x2bf   : > { %4388 = vmatprep.subr.bf16.mxu0 %v4783_v22 }
 0x2c2   : > { %4389 = vmatpush3.bf16.msra.mxu0 %v4707_v44 }
 0x2c3   : > { %4390 = vmatprep.subr.bf16.mxu0 %v4783_v22 }
 0x2c6   : > { %4391 = vmatpush3.bf16.msra.mxu0 %v4708_v45 }
 0x2c7   : > { %4392 = vmatprep.subr.bf16.mxu0 %v4783_v22 }
 0x2ca   : > { %v1536_v59 = vpop.f32.mrb[20].mxu0  ;;  %4393 = vmatpush3.bf16.msra.mxu0 %v4709_v49  ;;  %v3509_v49 = vld [vmem:[%s5574_s10] sm:$0x1] }
 0x2cb   : > { %v1545_v60 = vmax.f32 %v4418_v48, %v1536_v59  ;;  %v4144_v61 = vpop.f32.mrb[21].mxu0  ;;  %4394 = vmatprep.subr.bf16.mxu0 %v4783_v22  ;;  %v4690_v59 = vld [vmem:[%s5569_s5 + $0x90] sm:$0xff]  }
 0x2cc   : > { %v1539_v62 = vpop.f32.mrb[22].mxu0 }
 0x2cd   : > { %v1546_v63 = vmax.f32 %v4419_v52, %v1539_v62  ;;  %v4145_v0 = vpop.f32.mrb[23].mxu0  ;;  %v4689_v52 = vld [vmem:[%s5569_s5 + $0x88] sm:$0x7f]  }
 0x2ce   : > { %v2893_v55 = vand.u32 %v4689_v52, %v5243_v57  ;;  %v4693_v0 = vld [vmem:[%s5569_s5 + $0xa8] sm:$0x7f]  }
 0x31a   : > { %v1936_v1 = vpop.f32.mrb[4].mxu1 }
 0x31b   : > { %v1945_v2 = vmax.f32 %v1545_v60, %v1936_v1  ;;  %v4198_v3 = vpop.f32.mrb[5].mxu1  ;;  %v4691_v60 = vld [vmem:[%s5569_s5 + $0x98] sm:$0x7f]  }
 0x31c   : > { %v1939_v4 = vpop.f32.mrb[6].mxu1  ;;  %v2958_v62 = vand.u32 %v4691_v60, %v5243_v57  ;;  %v4694_v3 = vld [vmem:[%s5569_s5 + $0xb0] sm:$0xff]  }
 0x31d   : > { %v5247_v5 = vmax.f32 %v1546_v63, %v1939_v4  ;;  %v4199_v6 = vpop.f32.mrb[7].mxu1  ;;  %v4692_v63 = vld [vmem:[%s5569_s5 + $0xa0] sm:$0xff]   ;;  %v4695_v4 = vld [vmem:[%s5569_s5 + $0xb8] sm:$0x7f]  }
 0x31e   : > { %v3087_v6 = vand.u32 %v4695_v4, %v5243_v57 }
 0x332   : > { %v2326_v7 = vpop.f32.mrb[24].mxu0 }
 0x333   : > { %v2335_v8 = vmax.f32 %v1945_v2, %v2326_v7  ;;  %v4252_v9 = vpop.f32.mrb[25].mxu0  ;;  %v3023_v2 = vand.u32 %v4693_v0, %v5243_v57  ;;  %v4696_v7 = vld [vmem:[%s5569_s5 + $0xc0] sm:$0xff]  }
 0x334   : > { %v5249_v11 = vpop.f32.mrb[26].mxu0 }
 0x335   : > { %v2349_v12 = vadd.f32 %v2342_v10, %v2335_v8  ;;  %v2336_v13 = vmax.f32 %v5247_v5, %v5249_v11  ;;  %v4253_v14 = vpop.f32.mrb[27].mxu0  ;;  %v4697_v8 = vld [vmem:[%s5569_s5 + $0xc8] sm:$0x7f]   ;;  %v4698_v11 = vld [vmem:[%s5569_s5 + $0xd0] sm:$0xff]  }
 0x336   : > { %v3151_v10 = vand.u32 %v4697_v8, %v5243_v57 }
 0x337   : > { %v2351_v15 = vmax.f32 %v2349_v12, 0.0  ;;  %v2350_v56 = vadd.f32 %v2347_v54, %v2336_v13  ;;  %v4699_v12 = vld [vmem:[%s5569_s5 + $0xd8] sm:$0x7f]  }
 0x338   : > { %v3215_v14 = vand.u32 %v4699_v12, %v5243_v57 }
 0x339   : > { %v5259_v18 = vpack.c.bf16 %v2351_v15, %v2351_v15  ;;  %v2352_v58 = vmax.f32 %v2350_v56, 0.0  ;;  %v4700_v15 = vld [vmem:[%s5569_s5 + $0xe0] sm:$0xff]  }
 0x33b   : > { %4259 = vmatmul.mubr.msk.bf16.vlgmr.msra.gmra.mrb[8].mxu1 %vm2370_vm7, %v5259_v18  ;;  %v5275_v23 = vshrl.u32 %v5259_v18, 16  ;;  %v2493_v27 = vrot.slane %v5259_v18, 1  ;;  %v2621_v35 = vrot.slane %v5259_v18, 2  ;;  %v2749_v48 = vrot.slane %v5259_v18, 3 }
 0x33c   : > { %4263 = vmatpush3.bf16.msra.mxu1 %v4674_v16  ;;  %4266 = vmatprep.mubr.msk.bf16.mxu1 %vm4784_vm2, %v4783_v22  ;;  %v2872_v61 = vpack.c.bf16 %v2352_v58, %v2352_v58  ;;  %v4701_v16 = vld [vmem:[%s5569_s5 + $0xe8] sm:$0x7f]  }
 0x33d   : > { %4264 = vmatprep.subr.bf16.mxu1 %v4783_v22  ;;  %v2557_v31 = vrot.slane %v5275_v23, 1  ;;  %v2685_v41 = vrot.slane %v5275_v23, 2  ;;  %v2813_v53 = vrot.slane %v5275_v23, 3  ;;  %v3279_v18 = vand.u32 %v4701_v16, %v5243_v57 }
 0x33e   : > { %v2941_v1 = vshrl.u32 %v2872_v61, 16  ;;  %v3007_v5 = vrot.slane %v2872_v61, 1  ;;  %v3135_v13 = vrot.slane %v2872_v61, 2  ;;  %v3263_v21 = vrot.slane %v2872_v61, 3 }
 0x340   : > { %4265 = vmatpush3.bf16.msra.mxu1 %v2444_v19  ;;  %v3071_v9 = vrot.slane %v2941_v1, 1  ;;  %v3199_v17 = vrot.slane %v2941_v1, 2  ;;  %v4702_v19 = vld [vmem:[%s5569_s5 + $0xf0] sm:$0xff]  }
 0x341   : > { %4270 = vmatprep.subr.bf16.mxu1 %v4783_v22 }
 0x347   : > { %4267 = vmatmul.mubr.msk.bf16.vlgmr.msra.gmra.mrb[8].mxu1 %vm2370_vm7, %v5275_v23 }
 0x348   : > { %4271 = vmatpush3.bf16.msra.mxu1 %v4676_v20  ;;  %4274 = vmatprep.mubr.msk.bf16.mxu1 %vm4784_vm2, %v4783_v22  ;;  %v4703_v20 = vld [vmem:[%s5569_s5 + $0xf8] sm:$0x7f]  }
 0x349   : > { %4272 = vmatprep.subr.bf16.mxu1 %v4783_v22  ;;  %v3343_v23 = vand.u32 %v4703_v20, %v5243_v57  ;;  %v4711_v57 = vld [vmem:[%s5571_s7 + $0x38] ss:$0 sps:$4 sm:$0xff]  }
 0x34a   : > { %v3454_v26 = vsel %vm656_vm3, %v4711_v57, 0 }
 0x34c   : > { %4273 = vmatpush3.bf16.msra.mxu1 %v2509_v24  ;;  %v3327_v24 = vrot.slane %v2941_v1, 3 }
 0x34d   : > { %4278 = vmatprep.subr.bf16.mxu1 %v4783_v22 }
 0x353   : > { %4275 = vmatmul.mubr.msk.bf16.vlgmr.msra.gmra.mrb[8].mxu1 %vm2370_vm7, %v2493_v27  ;;  %v2353_v27 = vld [vmem:[%s5570_s6] sm:$0x1] }
 0x354   : > { %4279 = vmatpush3.bf16.msra.mxu1 %v4678_v25  ;;  %4282 = vmatprep.mubr.msk.bf16.mxu1 %vm4784_vm2, %v4783_v22  ;;  %v4710_v25 = vld [vmem:[%s5571_s7 + $0x30] sm:$0xff]  }
 0x355   : > { %4280 = vmatprep.subr.bf16.mxu1 %v4783_v22  ;;  %4395 = vmatpush3.bf16.msra.mxu0 %v4710_v25 }
 0x356   : > { %4396 = vmatprep.subr.bf16.mxu0 %v4783_v22 }
 0x358   : > { %4281 = vmatpush3.bf16.msra.mxu1 %v2573_v28 }
 0x359   : > { %4286 = vmatprep.subr.bf16.mxu1 %v4783_v22  ;;  %4397 = vmatpush3.bf16.msra.mxu0 %v3454_v26 }
 0x35a   : > { %4402 = vmatprep.subr.bf16.mxu0 %v4783_v22 }
 0x35f   : > { %4283 = vmatmul.mubr.msk.bf16.vlgmr.msra.gmra.mrb[8].mxu1 %vm2370_vm7, %v2557_v31 }
 0x360   : > { %4287 = vmatpush3.bf16.msra.mxu1 %v4680_v29  ;;  %4290 = vmatprep.mubr.msk.bf16.mxu1 %vm4784_vm2, %v4783_v22 }
 0x361   : > { %4288 = vmatprep.subr.bf16.mxu1 %v4783_v22 }
 0x364   : > { %4289 = vmatpush3.bf16.msra.mxu1 %v2637_v32 }
 0x365   : > { %4294 = vmatprep.subr.bf16.mxu1 %v4783_v22 }
 0x36b   : > { %4291 = vmatmul.mubr.msk.bf16.vlgmr.msra.gmra.mrb[8].mxu1 %vm2370_vm7, %v2621_v35 }
 0x36c   : > { %4295 = vmatpush3.bf16.msra.mxu1 %v4682_v33  ;;  %4298 = vmatprep.mubr.msk.bf16.mxu1 %vm4784_vm2, %v4783_v22 }
 0x36d   : > { %4296 = vmatprep.subr.bf16.mxu1 %v4783_v22 }
 0x370   : > { %4297 = vmatpush3.bf16.msra.mxu1 %v2701_v36  ;;  %v4713_v36 = vld [vmem:[%s5573_s9 + $0x8] sm:$0xff]  }
 0x371   : > { %4302 = vmatprep.subr.bf16.mxu1 %v4783_v22 }
 0x377   : > { %4299 = vmatmul.mubr.msk.bf16.vlgmr.msra.gmra.mrb[8].mxu1 %vm2370_vm7, %v2685_v41  ;;  %v3548_v41 = vsel %vm474_vm1, %v4717_v40, 0 }
 0x378   : > { %4303 = vmatpush3.bf16.msra.mxu1 %v4684_v39  ;;  %4306 = vmatprep.mubr.msk.bf16.mxu1 %vm4784_vm2, %v4783_v22  ;;  %v4716_v39 = vld [vmem:[%s5573_s9 + $0x20] sm:$0xff]  }
 0x379   : > { %4304 = vmatprep.subr.bf16.mxu1 %v4783_v22 }
 0x37c   : > { %4305 = vmatpush3.bf16.msra.mxu1 %v2765_v43 }
 0x37d   : > { %4310 = vmatprep.subr.bf16.mxu1 %v4783_v22 }
 0x383   : > { %4307 = vmatmul.mubr.msk.bf16.vlgmr.msra.gmra.mrb[8].mxu1 %vm2370_vm7, %v2749_v48 }
 0x384   : > { %4311 = vmatpush3.bf16.msra.mxu1 %v4686_v46  ;;  %4314 = vmatprep.mubr.msk.bf16.mxu1 %vm4784_vm2, %v4783_v22 }
 0x385   : > { %4312 = vmatprep.subr.bf16.mxu1 %v4783_v22 }
 0x388   : > { %4313 = vmatpush3.bf16.msra.mxu1 %v2829_v50 }
 0x389   : > { %4318 = vmatprep.subr.bf16.mxu1 %v4783_v22 }
 0x38f   : > { %4315 = vmatmul.mubr.msk.bf16.vlgmr.msra.gmra.mrb[8].mxu1 %vm2370_vm7, %v2813_v53 }
 0x390   : > { %4319 = vmatpush3.bf16.msra.mxu1 %v4688_v51  ;;  %4322 = vmatprep.mubr.msk.bf16.mxu1 %vm4784_vm2, %v4783_v22 }
 0x391   : > { %4320 = vmatprep.subr.bf16.mxu1 %v4783_v22 }
 0x394   : > { %4321 = vmatpush3.bf16.msra.mxu1 %v2893_v55 }
 0x395   : > { %4326 = vmatprep.subr.bf16.mxu1 %v4783_v22 }
 0x39b   : > { %4323 = vmatmul.mubr.msk.bf16.vlgmr.msra.gmra.mrb[8].mxu1 %vm2370_vm7, %v2872_v61 }
 0x39c   : > { %4327 = vmatpush3.bf16.msra.mxu1 %v4690_v59  ;;  %4330 = vmatprep.mubr.msk.bf16.mxu1 %vm4784_vm2, %v4783_v22 }
 0x39d   : > { %4328 = vmatprep.subr.bf16.mxu1 %v4783_v22 }
 0x3a0   : > { %4329 = vmatpush3.bf16.msra.mxu1 %v2958_v62 }
 0x3a1   : > { %4334 = vmatprep.subr.bf16.mxu1 %v4783_v22 }
 0x3a7   : > { %4331 = vmatmul.mubr.msk.bf16.vlgmr.msra.gmra.mrb[8].mxu1 %vm2370_vm7, %v2941_v1 }
 0x3a8   : > { %4335 = vmatpush3.bf16.msra.mxu1 %v4692_v63  ;;  %4338 = vmatprep.mubr.msk.bf16.mxu1 %vm4784_vm2, %v4783_v22 }
 0x3a9   : > { %4336 = vmatprep.subr.bf16.mxu1 %v4783_v22 }
 0x3ac   : > { %4337 = vmatpush3.bf16.msra.mxu1 %v3023_v2 }
 0x3ad   : > { %4342 = vmatprep.subr.bf16.mxu1 %v4783_v22 }
 0x3b3   : > { %4339 = vmatmul.mubr.msk.bf16.vlgmr.msra.gmra.mrb[8].mxu1 %vm2370_vm7, %v3007_v5 }
 0x3b4   : > { %4343 = vmatpush3.bf16.msra.mxu1 %v4694_v3  ;;  %4346 = vmatprep.mubr.msk.bf16.mxu1 %vm4784_vm2, %v4783_v22 }
 0x3b5   : > { %4344 = vmatprep.subr.bf16.mxu1 %v4783_v22 }
 0x3b8   : > { %4345 = vmatpush3.bf16.msra.mxu1 %v3087_v6 }
 0x3b9   : > { %4350 = vmatprep.subr.bf16.mxu1 %v4783_v22 }
 0x3bf   : > { %4347 = vmatmul.mubr.msk.bf16.vlgmr.msra.gmra.mrb[8].mxu1 %vm2370_vm7, %v3071_v9 }
 0x3c0   : > { %4351 = vmatpush3.bf16.msra.mxu1 %v4696_v7  ;;  %4354 = vmatprep.mubr.msk.bf16.mxu1 %vm4784_vm2, %v4783_v22 }
 0x3c1   : > { %4352 = vmatprep.subr.bf16.mxu1 %v4783_v22 }
 0x3c4   : > { %4353 = vmatpush3.bf16.msra.mxu1 %v3151_v10 }
 0x3c5   : > { %4358 = vmatprep.subr.bf16.mxu1 %v4783_v22 }
 0x3cb   : > { %4355 = vmatmul.mubr.msk.bf16.vlgmr.msra.gmra.mrb[8].mxu1 %vm2370_vm7, %v3135_v13 }
 0x3cc   : > { %4359 = vmatpush3.bf16.msra.mxu1 %v4698_v11  ;;  %4362 = vmatprep.mubr.msk.bf16.mxu1 %vm4784_vm2, %v4783_v22 }
 0x3cd   : > { %4360 = vmatprep.subr.bf16.mxu1 %v4783_v22 }
 0x3d0   : > { %4361 = vmatpush3.bf16.msra.mxu1 %v3215_v14 }
 0x3d1   : > { %4366 = vmatprep.subr.bf16.mxu1 %v4783_v22 }
 0x3d7   : > { %4363 = vmatmul.mubr.msk.bf16.vlgmr.msra.gmra.mrb[8].mxu1 %vm2370_vm7, %v3199_v17 }
 0x3d8   : > { %4367 = vmatpush3.bf16.msra.mxu1 %v4700_v15  ;;  %4370 = vmatprep.mubr.msk.bf16.mxu1 %vm4784_vm2, %v4783_v22 }
 0x3d9   : > { %4368 = vmatprep.subr.bf16.mxu1 %v4783_v22 }
 0x3dc   : > { %4369 = vmatpush3.bf16.msra.mxu1 %v3279_v18 }
 0x3dd   : > { %4374 = vmatprep.subr.bf16.mxu1 %v4783_v22 }
 0x3e3   : > { %4371 = vmatmul.mubr.msk.bf16.vlgmr.msra.gmra.mrb[8].mxu1 %vm2370_vm7, %v3263_v21 }
 0x3e4   : > { %4375 = vmatpush3.bf16.msra.mxu1 %v4702_v19  ;;  %4378 = vmatprep.mubr.msk.bf16.mxu1 %vm4784_vm2, %v4783_v22 }
 0x3e5   : > { %4376 = vmatprep.subr.bf16.mxu1 %v4783_v22 }
 0x3e8   : > { %4377 = vmatpush3.bf16.msra.mxu1 %v3343_v23 }
 0x3ef   : > { %4379 = vmatmul.mubr.msk.bf16.vlgmr.msra.gmra.mrb[8].mxu1 %vm2370_vm7, %v3327_v24 }
 0x4c2   : > { %v3379_v28 = vpop.f32.mrb[8].mxu1 }
 0x4c3   : > { %v4420_v29 = vadd.f32 %v3379_v28, %v2353_v27  ;;  %v4380_v30 = vpop.f32.mrb[9].mxu1 }
 0x4c4   : > { %v3382_v31 = vpop.f32.mrb[10].mxu1 }
 0x4c5   : > { %v3386_v32 = vmax.f32 %v4420_v29, 0.0  ;;  %v4381_v33 = vpop.f32.mrb[11].mxu1 }
 0x4c7   : > { %v3387_v35 = vpack.c.bf16 %v3386_v32, %v3386_v32 }
 0x4c9   : > { %4399 = vmatmul.mubr.msk.bf16.vlgmr.msra.gmra.mrb[28].mxu0 %vm3449_vm8, %v3387_v35 }
 0x4ca   : > { %4403 = vmatpush3.bf16.msra.mxu0 %v4712_v34  ;;  %4414 = vmatprep.mubr.msk.bf16.mxu0 %vm4784_vm2, %v4783_v22 }
 0x4cb   : > { %4404 = vmatprep.subr.bf16.mxu0 %v4783_v22 }
 0x4ce   : > { %4405 = vmatpush3.bf16.msra.mxu0 %v4713_v36 }
 0x4cf   : > { %4406 = vmatprep.subr.bf16.mxu0 %v4783_v22 }
 0x4d2   : > { %4407 = vmatpush3.bf16.msra.mxu0 %v4714_v37 }
 0x4d3   : > { %4408 = vmatprep.subr.bf16.mxu0 %v4783_v22 }
 0x4d6   : > { %4409 = vmatpush3.bf16.msra.mxu0 %v4715_v38 }
 0x4d7   : > { %4410 = vmatprep.subr.bf16.mxu0 %v4783_v22 }
 0x4da   : > { %4411 = vmatpush3.bf16.msra.mxu0 %v4716_v39 }
 0x4db   : > { %4412 = vmatprep.subr.bf16.mxu0 %v4783_v22 }
 0x4de   : > { %4413 = vmatpush3.bf16.msra.mxu0 %v3548_v41 }
 0x59c   : > { %v3490_v43 = vpop.f32.mrb[28].mxu0 }
 0x59d   : > { %v3491_v44 = vadd.f32 %v3490_v43, %v3403_v42  ;;  %v4400_v45 = vpop.f32.mrb[29].mxu0 }
 0x59e   : > { %v3493_v46 = vpop.f32.mrb[30].mxu0 }
 0x59f   : > { %v3496_v47 = vmax.f32 %v3491_v44, 0.0  ;;  %v4401_v48 = vpop.f32.mrb[31].mxu0 }
 0x5a1   : > { %v3497_v22 = vpack.c.bf16 %v3496_v47, %v3496_v47 }
 0x5a3   : > { %4415 = vmatmul.mubr.msk.bf16.vlgmr.msra.gmra.mrb[32].mxu0 %vm3543_vm9, %v3497_v22 }
 0x676   : > { %v3584_v50 = vpop.f32.mrb[32].mxu0 }
 0x677   : > { %v3585_v51 = vadd.f32 %v3584_v50, %v3509_v49  ;;  %v4416_v52 = vpop.f32.mrb[33].mxu0 }
 0x678   : > { %v3587_v53 = vpop.f32.mrb[34].mxu0 }
 0x679   : > { %v4417_v54 = vpop.f32.mrb[35].mxu0  ;;  %3591 = vst.msk [vmem:[%s378_s14] sm:$0x1] %vm3590_vm10, %v3585_v51 }
 0x67a   : > { %4731 = shalt.err (!%p4728_p3)
}
 0x67b   : > { %s4732_s29 = scalar_lea.hbm %s5522_s24, 16  ;;  %s4736_s22 = scalar_lea.hbm %s5575_s11, 32 }
 0x67c   : > { %p4733_p4 = scmp.ne.s32.totalorder %s5522_s24, %s4732_s29  ;;  %p4737_p9 = scmp.lt.u32.totalorder %s5522_s24, %s5575_s11 }
 0x67d   : > { %p4738_p10 = scmp.lt.u32.totalorder %s4736_s22, %s4732_s29  ;;  %p4740_p12 = scmp.lt.u32.totalorder %s4732_s29, %s5522_s24 }
 0x67e   : > { %p4734_p7 = pnand %p4733_p4, %p4888_p5 }
 0x67f   : > { %p4739_p11 = por %p4738_p10, %p4737_p9 }
 0x680   : > { %p4735_p8 = pneg %p4734_p7 }
 0x681   : > { %p4741_p13 = por %p4740_p12, %p4739_p11 }
 0x683   : > { %p4742_p0 = pnand %p4741_p13, %p4735_p8 }
 0x685   : > { %4745 = shalt.err (!%p4742_p0)
}
 0x686   : > { %4607 = dma.vmem_to_hbm [thread:$0]  (%p4888_p5), %s5524_s15, 16, %s5522_s24, %s3593_s21  }
 0x687 PF: > { %p4613_p1 = scmp.ge.s32.totalorder %s4780_s20, 2  ;;  %s3617_s25 = sand.u32 1, %s4768_s17  }
 0x688   : > { %s3618_s16 = scalar_lea.sflag [#allocation3], %s3617_s25 }
 0x689   : > { %p4610_p2 = pnand %p4613_p1, %p4892_p6 }
 0x68b   : > { %4763 = dma.done.wait (!%p4610_p2), %s3618_s16, 16  }
 0x68c   : > { %4765 = vsyncadd (!%p4610_p2), %s3618_s16, 4294967280  ;;  %p21_p3 = scmp.ge.s32.totalorder %s4875_s23, 4   ;;  %s5578_s17 = smov %s4772_s18 }
 0x68d   : > { %s5579_s18 = smov %s4776_s19  ;;  %s5580_s19 = smov %s4886_s26 }
 0x68e   : > { %s5581_s20 = smov %s4875_s23  ;;  %23 = sbr.rel (!%p21_p3) target bundleno = 3 (0x3), region = 122 }
 0x695   :  { %3622 = vsyncpa [#allocation3], 1 }
 0x696   :  { %3624 = vsyncpa [#allocation3 + $0x1], 1 }

</bundles_post_ra>
